<compile_context>
chip_gen: v7x
topology: tpu7x:2x2x1
jax: 0.10.0
libtpu: 0.0.40
codegen_flags: <defaults>
</compile_context>

<pallas_src>
import jax
import jax.numpy as jnp
from jax.experimental import pallas as pl
from jax.experimental.pallas import tpu as pltpu

LANE = 128   # pad every feature dim AND node-count dim to a multiple of this
TD = 128     # dst-row tile height streamed per DMA for each adjacency block


def _rup(x, m):
    return (x + m - 1) // m * m


def _pad2(x, rows, cols, dtype=None):
    r, c = x.shape
    y = jnp.pad(x, ((0, rows - r), (0, cols - c)))
    return y.astype(dtype) if dtype is not None else y


def _order_flops(ndst_p, nsrc_p, fin_p, fout_p):
    """(project_first?, matmul flops) chosen statically from padded dims."""
    pf = 2 * (nsrc_p * fin_p * fout_p + ndst_p * nsrc_p * fout_p)
    af = 2 * (ndst_p * nsrc_p * fin_p + ndst_p * fin_p * fout_p)
    return (pf <= af), min(pf, af)


def make_fused_kernel(steps):
    """steps: static tuple of (uses_split_weight, relu, concat) per layer.

    Ref layout:
      inputs : features, then per layer A (HBM/ANY), norm, W (or W_top, W_bot), b
      outputs: out
      scratch: per layer (2, TD, nsrc_p) bf16 double buffer + DMA sem (2,)
    """
    n_layers = len(steps)
    n_in = 1 + sum(5 if s[0] else 4 for s in steps)

    def kernel(*refs):
        in_refs = refs[:n_in]
        out_ref = refs[n_in]
        scratch = refs[n_in + 1:]
        abufs = [scratch[2 * l] for l in range(n_layers)]
        sems = [scratch[2 * l + 1] for l in range(n_layers)]

        # static unpack of per-layer refs
        layers = []
        idx = 1
        for split, _, _ in steps:
            n = 5 if split else 4
            layers.append(tuple(in_refs[idx:idx + n]))
            idx += n

        # ---- manual double-buffered streaming of adjacency dst-row tiles ----
        copies = {}

        def fetch(l, t, slot):
            a_ref = layers[l][0]
            cp = pltpu.make_async_copy(a_ref.at[pl.ds(t * TD, TD), :],
                                       abufs[l].at[slot],
                                       sems[l].at[slot])
            cp.start()
            copies[(l, t)] = cp

        for l in range(n_layers):        # first tile of every layer in flight
            fetch(l, 0, 0)

        h = in_refs[0][...]              # padded features (bf16), VMEM resident
        for l, (split, relu, concat) in enumerate(steps):
            refs_l = layers[l]
            a_ref, nrm_ref = refs_l[0], refs_l[1]
            b_ref = refs_l[-1]
            ndst_p, nsrc_p = a_ref.shape
            nt = ndst_p // TD
            bias = b_ref[...]                         # (1, fout_p)  f32
            fout_p = bias.shape[-1]
            is_last = (l == n_layers - 1)

            hb = h.astype(jnp.bfloat16)
            if split:
                # previous layer had concat=True; fold the concat:
                #   cat(h, relu(h)) @ W == h @ W_top + relu(h) @ W_bot
                wt_ref, wb_ref = refs_l[2], refs_l[3]
                hrb = jnp.maximum(h, 0.0).astype(jnp.bfloat16)
                proj = (jnp.dot(hb, wt_ref[...],
                                preferred_element_type=jnp.float32)
                        + jnp.dot(hrb, wb_ref[...],
                                  preferred_element_type=jnp.float32))
                project_first = True
            else:
                w_ref = refs_l[2]
                fin_p = w_ref.shape[0]
                project_first, _ = _order_flops(ndst_p, nsrc_p, fin_p, fout_p)
                if project_first:
                    proj = jnp.dot(hb, w_ref[...],
                                   preferred_element_type=jnp.float32)
            if project_first:
                proj_bf = proj.astype(jnp.bfloat16)

            tiles = []
            for t in range(nt):
                slot = t & 1
                copies.pop((l, t)).wait()
                if t + 1 < nt:                        # prefetch next A tile
                    fetch(l, t + 1, 1 - slot)
                a_tile = abufs[l][slot]               # (TD, nsrc_p) bf16
                nrm_t = nrm_ref[pl.ds(t * TD, TD), :]  # (TD, 1)  f32
                if project_first:
                    lin_t = (jnp.dot(a_tile, proj_bf,
                                     preferred_element_type=jnp.float32)
                             * nrm_t + bias)
                else:
                    agg_t = jnp.dot(a_tile, hb,
                                    preferred_element_type=jnp.float32) * nrm_t
                    lin_t = jnp.dot(agg_t.astype(jnp.bfloat16), w_ref[...],
                                    preferred_element_type=jnp.float32) + bias
                # explicitly zero padded dst rows (their norm is 0) so no bias
                # garbage can leak into later layers or the (sliced) output
                lin_t = jnp.where(nrm_t > 0.0, lin_t, 0.0)
                if relu and not concat:
                    lin_t = jnp.maximum(lin_t, 0.0)
                if is_last:
                    out_ref[pl.ds(t * TD, TD), :] = lin_t.astype(out_ref.dtype)
                else:
                    tiles.append(lin_t)

            if not is_last:
                # if concat: carry lin only; the next (split) layer folds
                # cat(lin, relu(lin)) into its split weights.
                h = tiles[0] if nt == 1 else jnp.concatenate(tiles, axis=0)

    return kernel


def make_gcn_infer(layer_cfgs):
    """layer_cfgs: sequence of (relu: bool, concat: bool) per NodeUpdate layer."""
    steps = []
    prev_concat = False
    for relu, concat in layer_cfgs:
        steps.append((bool(prev_concat), bool(relu), bool(concat)))
        prev_concat = concat
    steps = tuple(steps)
    assert not steps[-1][2], "last NodeUpdate layer must not concat"
    kernel = make_fused_kernel(steps)

    @jax.jit
    def forward(features, adjs, norms, weights, biases):
        n_last = adjs[-1].shape[0]
        n_classes = weights[-1].shape[1]

        vmem_in = pl.BlockSpec(memory_space=pltpu.MemorySpace.VMEM)
        hbm_in = pl.BlockSpec(memory_space=pl.ANY)

        def vbytes(arr):   # VMEM footprint incl. internal (sublane, lane) pad
            r, c = arr.shape
            sub = 16 if arr.dtype.itemsize == 2 else 8
            return _rup(r, sub) * _rup(c, LANE) * arr.dtype.itemsize

        n0, f0 = features.shape
        flat = [_pad2(features, _rup(n0, LANE), _rup(f0, LANE), jnp.bfloat16)]
        in_specs = [vmem_in]
        scratch_shapes = []
        flops = 0
        resident_bytes = vbytes(flat[0])
        stream_bytes = 0

        for (split, _, _), a, nrm, w, b in zip(steps, adjs, norms, weights, biases):
            ndst, nsrc = a.shape
            fin, fout = w.shape
            ndst_p, nsrc_p = _rup(ndst, LANE), _rup(nsrc, LANE)
            fout_p = _rup(fout, LANE)

            flat.append(_pad2(a, ndst_p, nsrc_p, jnp.bfloat16))  # HBM, streamed
            in_specs.append(hbm_in)
            stream_bytes += flat[-1].size * flat[-1].dtype.itemsize

            flat.append(_pad2(nrm.reshape(ndst, 1), ndst_p, 1))
            in_specs.append(vmem_in)
            resident_bytes += vbytes(flat[-1])

            if split:
                half = fin // 2
                half_p = _rup(half, LANE)
                flat.append(_pad2(w[:half], half_p, fout_p, jnp.bfloat16))
                flat.append(_pad2(w[half:], half_p, fout_p, jnp.bfloat16))
                in_specs += [vmem_in, vmem_in]
                resident_bytes += vbytes(flat[-1]) + vbytes(flat[-2])
                flops += 2 * (2 * half_p * nsrc_p * fout_p
                              + ndst_p * nsrc_p * fout_p)
            else:
                fin_p = _rup(fin, LANE)
                flat.append(_pad2(w, fin_p, fout_p, jnp.bfloat16))
                in_specs.append(vmem_in)
                resident_bytes += vbytes(flat[-1])
                flops += _order_flops(ndst_p, nsrc_p, fin_p, fout_p)[1]

            flat.append(_pad2(b.reshape(1, fout), 1, fout_p))
            in_specs.append(vmem_in)
            resident_bytes += vbytes(flat[-1])

            # double-buffered adjacency tile + its DMA semaphores
            scratch_shapes += [pltpu.VMEM((2, TD, nsrc_p), jnp.bfloat16),
                               pltpu.SemaphoreType.DMA((2,))]
            resident_bytes += 2 * TD * nsrc_p * 2
            # activations / projections held as values (VMEM-spill bound)
            resident_bytes += 4 * (nsrc_p * _rup(fin, LANE)
                                   + nsrc_p * fout_p + ndst_p * fout_p)

        out_rows = _rup(n_last, LANE)
        out_cols = _rup(n_classes, LANE)
        resident_bytes += out_rows * out_cols * 4

        vmem_limit = int(min(max(2 * resident_bytes + (8 << 20), 16 << 20),
                             100 << 20))
        cost = pl.CostEstimate(flops=int(flops), transcendentals=0,
                               bytes_accessed=int(resident_bytes + stream_bytes))

        out = pl.pallas_call(
            kernel,
            out_shape=jax.ShapeDtypeStruct((out_rows, out_cols), jnp.float32),
            in_specs=in_specs,
            out_specs=pl.BlockSpec(memory_space=pltpu.MemorySpace.VMEM),
            scratch_shapes=scratch_shapes,
            compiler_params=pltpu.CompilerParams(vmem_limit_bytes=vmem_limit),
            cost_estimate=cost,
        )(*flat)
        return out[:n_last, :n_classes]

    return forward


def init_params(key, in_feats, n_hidden, n_classes, n_layers):
    """Layer shapes/flags mirroring GCNInfer's ModuleList."""
    dims = []
    skip_start = (0 == n_layers - 1)
    dims.append((in_feats, n_hidden, True, skip_start))
    for i in range(1, n_layers):
        skip_start = (i == n_layers - 1)
        dims.append((n_hidden, n_hidden, True, skip_start))
    dims.append((2 * n_hidden, n_classes, False, False))

    cfgs, weights, biases = [], [], []
    for li, (fin, fout, relu, concat) in enumerate(dims):
        kw, kb = jax.random.split(jax.random.fold_in(key, li))
        bound = 1.0 / (fin ** 0.5)
        weights.append(jax.random.uniform(kw, (fin, fout), jnp.float32, -bound, bound))
        biases.append(jax.random.uniform(kb, (1, fout), jnp.float32, -bound, bound))
        cfgs.append((relu, concat))
    return cfgs, weights, biases


def make_block_graph(key, n_dst, n_src):
    """Binary sampled adjacency of one NodeFlow block + 1/deg norm (test=True)."""
    adj = jax.random.bernoulli(key, 0.4, (n_dst, n_src)).astype(jnp.float32)
    adj = adj.at[:, 0].set(1.0)                      # >= 1 neighbor per dst node
    norm = 1.0 / jnp.sum(adj, axis=1, keepdims=True)
    return adj, norm


def gcn_infer_reference(features, adjs, norms, weights, biases, cfgs):
    """Pure-JAX f32 reference in the original operation order."""
    h = features
    for a, nrm, w, b, (relu, concat) in zip(adjs, norms, weights, biases, cfgs):
        h = (a @ h) * nrm            # sum-aggregate then per-node norm
        h = h @ w + b                # linear
        if concat:
            h = jnp.concatenate([h, jnp.maximum(h, 0.0)], axis=1)
        elif relu:
            h = jnp.maximum(h, 0.0)
    return h


if __name__ == "__main__":
    # Small problem consistent with the module: n_layers + 1 NodeFlow blocks.
    in_feats, n_hidden, n_classes, n_layers = 32, 16, 8, 2
    node_counts = [64, 32, 16, 8]

    key = jax.random.PRNGKey(0)
    k_feat, k_adj, k_par = jax.random.split(key, 3)

    features = jax.random.normal(k_feat, (node_counts[0], in_feats), jnp.float32)
    adjs, norms = [], []
    for i in range(n_layers + 1):
        a, nrm = make_block_graph(jax.random.fold_in(k_adj, i),
                                  node_counts[i + 1], node_counts[i])
        adjs.append(a)
        norms.append(nrm)
    cfgs, weights, biases = init_params(k_par, in_feats, n_hidden, n_classes, n_layers)

    forward = make_gcn_infer(cfgs)
    out = jax.block_until_ready(forward(features, adjs, norms, weights, biases))

    ref = gcn_infer_reference(features, adjs, norms, weights, biases, cfgs)
    assert out.shape == (node_counts[-1], n_classes), out.shape
    # bf16 MXU operands with f32 accumulation -> compare against the pure-f32
    # reference with a correspondingly relaxed tolerance.
    assert jnp.allclose(out, ref, atol=2e-2, rtol=2e-2), \
        float(jnp.max(jnp.abs(out - ref)))

    print("KERNEL_OK")
</pallas_src>

<mosaic_0001>
module attributes {stable_mosaic.version = 11 : i64} {
  func.func @kernel(%arg0: memref<128x128xbf16, #tpu.memory_space<vmem>>, %arg1: memref<128x128xbf16, #tpu.memory_space<any>>, %arg2: memref<128x1xf32, #tpu.memory_space<vmem>>, %arg3: memref<128x128xbf16, #tpu.memory_space<vmem>>, %arg4: memref<1x128xf32, #tpu.memory_space<vmem>>, %arg5: memref<128x128xbf16, #tpu.memory_space<any>>, %arg6: memref<128x1xf32, #tpu.memory_space<vmem>>, %arg7: memref<128x128xbf16, #tpu.memory_space<vmem>>, %arg8: memref<1x128xf32, #tpu.memory_space<vmem>>, %arg9: memref<128x128xbf16, #tpu.memory_space<any>>, %arg10: memref<128x1xf32, #tpu.memory_space<vmem>>, %arg11: memref<128x128xbf16, #tpu.memory_space<vmem>>, %arg12: memref<128x128xbf16, #tpu.memory_space<vmem>>, %arg13: memref<1x128xf32, #tpu.memory_space<vmem>>, %arg14: memref<128x128xf32, #tpu.memory_space<vmem>>, %arg15: memref<2x128x128xbf16, #tpu.memory_space<vmem>>, %arg16: memref<2x!tpu.dma_semaphore, #tpu.memory_space<semaphore_mem>>, %arg17: memref<2x128x128xbf16, #tpu.memory_space<vmem>>, %arg18: memref<2x!tpu.dma_semaphore, #tpu.memory_space<semaphore_mem>>, %arg19: memref<2x128x128xbf16, #tpu.memory_space<vmem>>, %arg20: memref<2x!tpu.dma_semaphore, #tpu.memory_space<semaphore_mem>>) attributes {dimension_semantics = [], scalar_prefetch = 0 : i64, scratch_operands = 6 : i64, tpu.core_type = #tpu.core_type<tc>} {
    %c0_i32 = arith.constant 0 : i32
    %c0_i32_0 = arith.constant 0 : i32
    %c0_i32_1 = arith.constant 0 : i32
    %c0_i32_2 = arith.constant 0 : i32
    %0 = tpu.memref_slice %arg1[%c0_i32_1, %c0_i32_2] : memref<128x128xbf16, #tpu.memory_space<any>> -> memref<128x128xbf16, #tpu.memory_space<any>>
    %c0_i32_3 = arith.constant 0 : i32
    %c0_i32_4 = arith.constant 0 : i32
    %1 = tpu.memref_slice %arg15[%c0_i32, %c0_i32_3, %c0_i32_4] : memref<2x128x128xbf16, #tpu.memory_space<vmem>> -> memref<1x128x128xbf16, #tpu.memory_space<vmem>>
    %2 = tpu.memref_squeeze %1 : memref<1x128x128xbf16, #tpu.memory_space<vmem>> -> memref<128x128xbf16, #tpu.memory_space<vmem>>
    %3 = tpu.memref_slice %arg16[%c0_i32_0] : memref<2x!tpu.dma_semaphore, #tpu.memory_space<semaphore_mem>> -> memref<1x!tpu.dma_semaphore, #tpu.memory_space<semaphore_mem>>
    %4 = tpu.memref_squeeze %3 : memref<1x!tpu.dma_semaphore, #tpu.memory_space<semaphore_mem>> -> memref<!tpu.dma_semaphore, #tpu.memory_space<semaphore_mem>>
    tpu.enqueue_dma source(%0 : memref<128x128xbf16, #tpu.memory_space<any>>) target(%2 : memref<128x128xbf16, #tpu.memory_space<vmem>>) target_semaphore(%4 : memref<!tpu.dma_semaphore, #tpu.memory_space<semaphore_mem>>)
    %c0_i32_5 = arith.constant 0 : i32
    %c0_i32_6 = arith.constant 0 : i32
    %c0_i32_7 = arith.constant 0 : i32
    %c0_i32_8 = arith.constant 0 : i32
    %5 = tpu.memref_slice %arg5[%c0_i32_7, %c0_i32_8] : memref<128x128xbf16, #tpu.memory_space<any>> -> memref<128x128xbf16, #tpu.memory_space<any>>
    %c0_i32_9 = arith.constant 0 : i32
    %c0_i32_10 = arith.constant 0 : i32
    %6 = tpu.memref_slice %arg17[%c0_i32_5, %c0_i32_9, %c0_i32_10] : memref<2x128x128xbf16, #tpu.memory_space<vmem>> -> memref<1x128x128xbf16, #tpu.memory_space<vmem>>
    %7 = tpu.memref_squeeze %6 : memref<1x128x128xbf16, #tpu.memory_space<vmem>> -> memref<128x128xbf16, #tpu.memory_space<vmem>>
    %8 = tpu.memref_slice %arg18[%c0_i32_6] : memref<2x!tpu.dma_semaphore, #tpu.memory_space<semaphore_mem>> -> memref<1x!tpu.dma_semaphore, #tpu.memory_space<semaphore_mem>>
    %9 = tpu.memref_squeeze %8 : memref<1x!tpu.dma_semaphore, #tpu.memory_space<semaphore_mem>> -> memref<!tpu.dma_semaphore, #tpu.memory_space<semaphore_mem>>
    tpu.enqueue_dma source(%5 : memref<128x128xbf16, #tpu.memory_space<any>>) target(%7 : memref<128x128xbf16, #tpu.memory_space<vmem>>) target_semaphore(%9 : memref<!tpu.dma_semaphore, #tpu.memory_space<semaphore_mem>>)
    %c0_i32_11 = arith.constant 0 : i32
    %c0_i32_12 = arith.constant 0 : i32
    %c0_i32_13 = arith.constant 0 : i32
    %c0_i32_14 = arith.constant 0 : i32
    %10 = tpu.memref_slice %arg9[%c0_i32_13, %c0_i32_14] : memref<128x128xbf16, #tpu.memory_space<any>> -> memref<128x128xbf16, #tpu.memory_space<any>>
    %c0_i32_15 = arith.constant 0 : i32
    %c0_i32_16 = arith.constant 0 : i32
    %11 = tpu.memref_slice %arg19[%c0_i32_11, %c0_i32_15, %c0_i32_16] : memref<2x128x128xbf16, #tpu.memory_space<vmem>> -> memref<1x128x128xbf16, #tpu.memory_space<vmem>>
    %12 = tpu.memref_squeeze %11 : memref<1x128x128xbf16, #tpu.memory_space<vmem>> -> memref<128x128xbf16, #tpu.memory_space<vmem>>
    %13 = tpu.memref_slice %arg20[%c0_i32_12] : memref<2x!tpu.dma_semaphore, #tpu.memory_space<semaphore_mem>> -> memref<1x!tpu.dma_semaphore, #tpu.memory_space<semaphore_mem>>
    %14 = tpu.memref_squeeze %13 : memref<1x!tpu.dma_semaphore, #tpu.memory_space<semaphore_mem>> -> memref<!tpu.dma_semaphore, #tpu.memory_space<semaphore_mem>>
    tpu.enqueue_dma source(%10 : memref<128x128xbf16, #tpu.memory_space<any>>) target(%12 : memref<128x128xbf16, #tpu.memory_space<vmem>>) target_semaphore(%14 : memref<!tpu.dma_semaphore, #tpu.memory_space<semaphore_mem>>)
    %c0 = arith.constant 0 : index
    %c0_17 = arith.constant 0 : index
    %15 = vector.load %arg0[%c0, %c0_17] : memref<128x128xbf16, #tpu.memory_space<vmem>>, vector<128x128xbf16>
    %c0_18 = arith.constant 0 : index
    %c0_19 = arith.constant 0 : index
    %16 = vector.load %arg4[%c0_18, %c0_19] : memref<1x128xf32, #tpu.memory_space<vmem>>, vector<1x128xf32>
    %c0_20 = arith.constant 0 : index
    %c0_21 = arith.constant 0 : index
    %17 = vector.load %arg3[%c0_20, %c0_21] : memref<128x128xbf16, #tpu.memory_space<vmem>>, vector<128x128xbf16>
    %cst = arith.constant dense<0.000000e+00> : vector<128x128xf32>
    %18 = tpu.matmul %15, %17, %cst {dimension_numbers = #tpu.dot_dimension_numbers<[1], [0], [0], [1], [0, 0, 1, 1], [], []>} : vector<128x128xbf16>, vector<128x128xbf16>, vector<128x128xf32> -> vector<128x128xf32>
    %19 = arith.truncf %18 : vector<128x128xf32> to vector<128x128xbf16>
    %c0_i32_22 = arith.constant 0 : i32
    %c0_i32_23 = arith.constant 0 : i32
    %c0_i32_24 = arith.constant 0 : i32
    %c0_i32_25 = arith.constant 0 : i32
    %20 = tpu.memref_slice %arg1[%c0_i32_24, %c0_i32_25] : memref<128x128xbf16, #tpu.memory_space<any>> -> memref<128x128xbf16, #tpu.memory_space<any>>
    %c0_i32_26 = arith.constant 0 : i32
    %c0_i32_27 = arith.constant 0 : i32
    %21 = tpu.memref_slice %arg15[%c0_i32_22, %c0_i32_26, %c0_i32_27] : memref<2x128x128xbf16, #tpu.memory_space<vmem>> -> memref<1x128x128xbf16, #tpu.memory_space<vmem>>
    %22 = tpu.memref_squeeze %21 : memref<1x128x128xbf16, #tpu.memory_space<vmem>> -> memref<128x128xbf16, #tpu.memory_space<vmem>>
    %23 = tpu.memref_slice %arg16[%c0_i32_23] : memref<2x!tpu.dma_semaphore, #tpu.memory_space<semaphore_mem>> -> memref<1x!tpu.dma_semaphore, #tpu.memory_space<semaphore_mem>>
    %24 = tpu.memref_squeeze %23 : memref<1x!tpu.dma_semaphore, #tpu.memory_space<semaphore_mem>> -> memref<!tpu.dma_semaphore, #tpu.memory_space<semaphore_mem>>
    tpu.wait_dma2 semaphore(%24 : memref<!tpu.dma_semaphore, #tpu.memory_space<semaphore_mem>>) src(%20 : memref<128x128xbf16, #tpu.memory_space<any>>) dst(%22 : memref<128x128xbf16, #tpu.memory_space<vmem>>)
    %c0_28 = arith.constant 0 : index
    %c0_29 = arith.constant 0 : index
    %c0_30 = arith.constant 0 : index
    %25 = vector.load %arg15[%c0_28, %c0_29, %c0_30] : memref<2x128x128xbf16, #tpu.memory_space<vmem>>, vector<1x128x128xbf16>
    %26 = vector.shape_cast %25 : vector<1x128x128xbf16> to vector<128x128xbf16>
    %c0_31 = arith.constant 0 : index
    %c0_32 = arith.constant 0 : index
    %27 = vector.load %arg2[%c0_31, %c0_32] : memref<128x1xf32, #tpu.memory_space<vmem>>, vector<128x1xf32>
    %cst_33 = arith.constant dense<0.000000e+00> : vector<128x128xf32>
    %28 = tpu.matmul %26, %19, %cst_33 {dimension_numbers = #tpu.dot_dimension_numbers<[1], [0], [0], [1], [0, 0, 1, 1], [], []>} : vector<128x128xbf16>, vector<128x128xbf16>, vector<128x128xf32> -> vector<128x128xf32>
    %29 = vector.broadcast %27 : vector<128x1xf32> to vector<128x128xf32>
    %30 = arith.mulf %28, %29 : vector<128x128xf32>
    %31 = vector.broadcast %16 : vector<1x128xf32> to vector<128x128xf32>
    %32 = arith.addf %30, %31 : vector<128x128xf32>
    %cst_34 = arith.constant 0.000000e+00 : f32
    %33 = vector.broadcast %cst_34 : f32 to vector<128x1xf32>
    %34 = arith.cmpf ogt, %27, %33 : vector<128x1xf32>
    %cst_35 = arith.constant 0.000000e+00 : f32
    %35 = vector.shape_cast %34 : vector<128x1xi1> to vector<128x1xi1>
    %36 = vector.broadcast %35 : vector<128x1xi1> to vector<128x128xi1>
    %37 = vector.broadcast %cst_35 : f32 to vector<128x128xf32>
    %38 = arith.select %36, %32, %37 : vector<128x128xi1>, vector<128x128xf32>
    %cst_36 = arith.constant 0.000000e+00 : f32
    %39 = vector.broadcast %cst_36 : f32 to vector<128x128xf32>
    %40 = arith.maximumf %38, %39 : vector<128x128xf32>
    %c0_37 = arith.constant 0 : index
    %c0_38 = arith.constant 0 : index
    %41 = vector.load %arg8[%c0_37, %c0_38] : memref<1x128xf32, #tpu.memory_space<vmem>>, vector<1x128xf32>
    %42 = arith.truncf %40 : vector<128x128xf32> to vector<128x128xbf16>
    %c0_39 = arith.constant 0 : index
    %c0_40 = arith.constant 0 : index
    %43 = vector.load %arg7[%c0_39, %c0_40] : memref<128x128xbf16, #tpu.memory_space<vmem>>, vector<128x128xbf16>
    %cst_41 = arith.constant dense<0.000000e+00> : vector<128x128xf32>
    %44 = tpu.matmul %42, %43, %cst_41 {dimension_numbers = #tpu.dot_dimension_numbers<[1], [0], [0], [1], [0, 0, 1, 1], [], []>} : vector<128x128xbf16>, vector<128x128xbf16>, vector<128x128xf32> -> vector<128x128xf32>
    %45 = arith.truncf %44 : vector<128x128xf32> to vector<128x128xbf16>
    %c0_i32_42 = arith.constant 0 : i32
    %c0_i32_43 = arith.constant 0 : i32
    %c0_i32_44 = arith.constant 0 : i32
    %c0_i32_45 = arith.constant 0 : i32
    %46 = tpu.memref_slice %arg5[%c0_i32_44, %c0_i32_45] : memref<128x128xbf16, #tpu.memory_space<any>> -> memref<128x128xbf16, #tpu.memory_space<any>>
    %c0_i32_46 = arith.constant 0 : i32
    %c0_i32_47 = arith.constant 0 : i32
    %47 = tpu.memref_slice %arg17[%c0_i32_42, %c0_i32_46, %c0_i32_47] : memref<2x128x128xbf16, #tpu.memory_space<vmem>> -> memref<1x128x128xbf16, #tpu.memory_space<vmem>>
    %48 = tpu.memref_squeeze %47 : memref<1x128x128xbf16, #tpu.memory_space<vmem>> -> memref<128x128xbf16, #tpu.memory_space<vmem>>
    %49 = tpu.memref_slice %arg18[%c0_i32_43] : memref<2x!tpu.dma_semaphore, #tpu.memory_space<semaphore_mem>> -> memref<1x!tpu.dma_semaphore, #tpu.memory_space<semaphore_mem>>
    %50 = tpu.memref_squeeze %49 : memref<1x!tpu.dma_semaphore, #tpu.memory_space<semaphore_mem>> -> memref<!tpu.dma_semaphore, #tpu.memory_space<semaphore_mem>>
    tpu.wait_dma2 semaphore(%50 : memref<!tpu.dma_semaphore, #tpu.memory_space<semaphore_mem>>) src(%46 : memref<128x128xbf16, #tpu.memory_space<any>>) dst(%48 : memref<128x128xbf16, #tpu.memory_space<vmem>>)
    %c0_48 = arith.constant 0 : index
    %c0_49 = arith.constant 0 : index
    %c0_50 = arith.constant 0 : index
    %51 = vector.load %arg17[%c0_48, %c0_49, %c0_50] : memref<2x128x128xbf16, #tpu.memory_space<vmem>>, vector<1x128x128xbf16>
    %52 = vector.shape_cast %51 : vector<1x128x128xbf16> to vector<128x128xbf16>
    %c0_51 = arith.constant 0 : index
    %c0_52 = arith.constant 0 : index
    %53 = vector.load %arg6[%c0_51, %c0_52] : memref<128x1xf32, #tpu.memory_space<vmem>>, vector<128x1xf32>
    %cst_53 = arith.constant dense<0.000000e+00> : vector<128x128xf32>
    %54 = tpu.matmul %52, %45, %cst_53 {dimension_numbers = #tpu.dot_dimension_numbers<[1], [0], [0], [1], [0, 0, 1, 1], [], []>} : vector<128x128xbf16>, vector<128x128xbf16>, vector<128x128xf32> -> vector<128x128xf32>
    %55 = vector.broadcast %53 : vector<128x1xf32> to vector<128x128xf32>
    %56 = arith.mulf %54, %55 : vector<128x128xf32>
    %57 = vector.broadcast %41 : vector<1x128xf32> to vector<128x128xf32>
    %58 = arith.addf %56, %57 : vector<128x128xf32>
    %cst_54 = arith.constant 0.000000e+00 : f32
    %59 = vector.broadcast %cst_54 : f32 to vector<128x1xf32>
    %60 = arith.cmpf ogt, %53, %59 : vector<128x1xf32>
    %cst_55 = arith.constant 0.000000e+00 : f32
    %61 = vector.shape_cast %60 : vector<128x1xi1> to vector<128x1xi1>
    %62 = vector.broadcast %61 : vector<128x1xi1> to vector<128x128xi1>
    %63 = vector.broadcast %cst_55 : f32 to vector<128x128xf32>
    %64 = arith.select %62, %58, %63 : vector<128x128xi1>, vector<128x128xf32>
    %c0_56 = arith.constant 0 : index
    %c0_57 = arith.constant 0 : index
    %65 = vector.load %arg13[%c0_56, %c0_57] : memref<1x128xf32, #tpu.memory_space<vmem>>, vector<1x128xf32>
    %66 = arith.truncf %64 : vector<128x128xf32> to vector<128x128xbf16>
    %cst_58 = arith.constant 0.000000e+00 : f32
    %67 = vector.broadcast %cst_58 : f32 to vector<128x128xf32>
    %68 = arith.maximumf %64, %67 : vector<128x128xf32>
    %69 = arith.truncf %68 : vector<128x128xf32> to vector<128x128xbf16>
    %c0_59 = arith.constant 0 : index
    %c0_60 = arith.constant 0 : index
    %70 = vector.load %arg11[%c0_59, %c0_60] : memref<128x128xbf16, #tpu.memory_space<vmem>>, vector<128x128xbf16>
    %cst_61 = arith.constant dense<0.000000e+00> : vector<128x128xf32>
    %71 = tpu.matmul %66, %70, %cst_61 {dimension_numbers = #tpu.dot_dimension_numbers<[1], [0], [0], [1], [0, 0, 1, 1], [], []>} : vector<128x128xbf16>, vector<128x128xbf16>, vector<128x128xf32> -> vector<128x128xf32>
    %c0_62 = arith.constant 0 : index
    %c0_63 = arith.constant 0 : index
    %72 = vector.load %arg12[%c0_62, %c0_63] : memref<128x128xbf16, #tpu.memory_space<vmem>>, vector<128x128xbf16>
    %cst_64 = arith.constant dense<0.000000e+00> : vector<128x128xf32>
    %73 = tpu.matmul %69, %72, %cst_64 {dimension_numbers = #tpu.dot_dimension_numbers<[1], [0], [0], [1], [0, 0, 1, 1], [], []>} : vector<128x128xbf16>, vector<128x128xbf16>, vector<128x128xf32> -> vector<128x128xf32>
    %74 = arith.addf %71, %73 : vector<128x128xf32>
    %75 = arith.truncf %74 : vector<128x128xf32> to vector<128x128xbf16>
    %c0_i32_65 = arith.constant 0 : i32
    %c0_i32_66 = arith.constant 0 : i32
    %c0_i32_67 = arith.constant 0 : i32
    %c0_i32_68 = arith.constant 0 : i32
    %76 = tpu.memref_slice %arg9[%c0_i32_67, %c0_i32_68] : memref<128x128xbf16, #tpu.memory_space<any>> -> memref<128x128xbf16, #tpu.memory_space<any>>
    %c0_i32_69 = arith.constant 0 : i32
    %c0_i32_70 = arith.constant 0 : i32
    %77 = tpu.memref_slice %arg19[%c0_i32_65, %c0_i32_69, %c0_i32_70] : memref<2x128x128xbf16, #tpu.memory_space<vmem>> -> memref<1x128x128xbf16, #tpu.memory_space<vmem>>
    %78 = tpu.memref_squeeze %77 : memref<1x128x128xbf16, #tpu.memory_space<vmem>> -> memref<128x128xbf16, #tpu.memory_space<vmem>>
    %79 = tpu.memref_slice %arg20[%c0_i32_66] : memref<2x!tpu.dma_semaphore, #tpu.memory_space<semaphore_mem>> -> memref<1x!tpu.dma_semaphore, #tpu.memory_space<semaphore_mem>>
    %80 = tpu.memref_squeeze %79 : memref<1x!tpu.dma_semaphore, #tpu.memory_space<semaphore_mem>> -> memref<!tpu.dma_semaphore, #tpu.memory_space<semaphore_mem>>
    tpu.wait_dma2 semaphore(%80 : memref<!tpu.dma_semaphore, #tpu.memory_space<semaphore_mem>>) src(%76 : memref<128x128xbf16, #tpu.memory_space<any>>) dst(%78 : memref<128x128xbf16, #tpu.memory_space<vmem>>)
    %c0_71 = arith.constant 0 : index
    %c0_72 = arith.constant 0 : index
    %c0_73 = arith.constant 0 : index
    %81 = vector.load %arg19[%c0_71, %c0_72, %c0_73] : memref<2x128x128xbf16, #tpu.memory_space<vmem>>, vector<1x128x128xbf16>
    %82 = vector.shape_cast %81 : vector<1x128x128xbf16> to vector<128x128xbf16>
    %c0_74 = arith.constant 0 : index
    %c0_75 = arith.constant 0 : index
    %83 = vector.load %arg10[%c0_74, %c0_75] : memref<128x1xf32, #tpu.memory_space<vmem>>, vector<128x1xf32>
    %cst_76 = arith.constant dense<0.000000e+00> : vector<128x128xf32>
    %84 = tpu.matmul %82, %75, %cst_76 {dimension_numbers = #tpu.dot_dimension_numbers<[1], [0], [0], [1], [0, 0, 1, 1], [], []>} : vector<128x128xbf16>, vector<128x128xbf16>, vector<128x128xf32> -> vector<128x128xf32>
    %85 = vector.broadcast %83 : vector<128x1xf32> to vector<128x128xf32>
    %86 = arith.mulf %84, %85 : vector<128x128xf32>
    %87 = vector.broadcast %65 : vector<1x128xf32> to vector<128x128xf32>
    %88 = arith.addf %86, %87 : vector<128x128xf32>
    %cst_77 = arith.constant 0.000000e+00 : f32
    %89 = vector.broadcast %cst_77 : f32 to vector<128x1xf32>
    %90 = arith.cmpf ogt, %83, %89 : vector<128x1xf32>
    %cst_78 = arith.constant 0.000000e+00 : f32
    %91 = vector.shape_cast %90 : vector<128x1xi1> to vector<128x1xi1>
    %92 = vector.broadcast %91 : vector<128x1xi1> to vector<128x128xi1>
    %93 = vector.broadcast %cst_78 : f32 to vector<128x128xf32>
    %94 = arith.select %92, %88, %93 : vector<128x128xi1>, vector<128x128xf32>
    %c0_79 = arith.constant 0 : index
    %c0_80 = arith.constant 0 : index
    %95 = vector.load %arg14[%c0_79, %c0_80] : memref<128x128xf32, #tpu.memory_space<vmem>>, vector<128x128xf32>
    tpu.vector_store %arg14[%c0_79, %c0_80], %94 {strides = array<i32>} : memref<128x128xf32, #tpu.memory_space<vmem>>, vector<128x128xf32>,
    return
  }
}

</mosaic_0001>

<bundles_post_ra>
// kernel: forward.1
= control target key start
LH: loop header
LB: loop body
LE: loop exit
PB: predicated region body
PF: predicated region fallthrough
CT: control target
= control target key end

     0   :  { %s3521_s0 = inlined_call_operand.vmem [shape: bf16[128,128], index: 0, kind: input, shape index: {}]   ;;  %s3522_s1 = inlined_call_operand.vmem [shape: bf16[128,128], index: 1, kind: input, shape index: {}]   ;;  %s3523_s2 = inlined_call_operand.vmem [shape: f32[128,1], index: 2, kind: input, shape index: {}]   ;;  %s3524_s3 = inlined_call_operand.vmem [shape: bf16[128,128], index: 3, kind: input, shape index: {}]   ;;  %s3525_s4 = inlined_call_operand.vmem [shape: f32[1,128], index: 4, kind: input, shape index: {}]   ;;  %s3526_s5 = inlined_call_operand.vmem [shape: bf16[128,128], index: 5, kind: input, shape index: {}]   ;;  %s3527_s6 = inlined_call_operand.vmem [shape: f32[128,1], index: 6, kind: input, shape index: {}]   ;;  %s3528_s7 = inlined_call_operand.vmem [shape: bf16[128,128], index: 7, kind: input, shape index: {}]   ;;  %s3529_s8 = inlined_call_operand.vmem [shape: f32[1,128], index: 8, kind: input, shape index: {}]   ;;  %s3530_s9 = inlined_call_operand.vmem [shape: bf16[128,128], index: 9, kind: input, shape index: {}]   ;;  %s3531_s10 = inlined_call_operand.vmem [shape: f32[128,1], index: 10, kind: input, shape index: {}]   ;;  %s3532_s11 = inlined_call_operand.vmem [shape: bf16[128,128], index: 11, kind: input, shape index: {}]   ;;  %s3533_s12 = inlined_call_operand.vmem [shape: bf16[128,128], index: 12, kind: input, shape index: {}]   ;;  %s3534_s13 = inlined_call_operand.vmem [shape: f32[1,128], index: 13, kind: input, shape index: {}]   ;;  %s3535_s14 = inlined_call_operand.vmem [shape: f32[128,128], index: 14, kind: output, shape index: {}]  }
   0x1   :  { %v2702_v0 = vld [vmem:[%s3522_s1] sm:$0xff]  ;;  %v2707_v1 = vld [vmem:[%s3522_s1 + $0x8] sm:$0xff]  ;;  %v2712_v2 = vld [vmem:[%s3522_s1 + $0x10] sm:$0xff] }
   0x2   :  { %v2717_v3 = vld [vmem:[%s3522_s1 + $0x18] sm:$0xff]  ;;  %v2722_v4 = vld [vmem:[%s3522_s1 + $0x20] sm:$0xff]  ;;  %v2727_v5 = vld [vmem:[%s3522_s1 + $0x28] sm:$0xff] }
   0x3   :  { %v2732_v6 = vld [vmem:[%s3522_s1 + $0x30] sm:$0xff]  ;;  %v2737_v7 = vld [vmem:[%s3522_s1 + $0x38] sm:$0xff] }
   0x4   :  { %97 = vsyncadd [#allocation3], 1024  ;;  %v2742_v8 = vld [vmem:[%s3526_s5] sm:$0xff]  ;;  %v2747_v9 = vld [vmem:[%s3526_s5 + $0x8] sm:$0xff] }
   0x5   :  { %v2752_v10 = vld [vmem:[%s3526_s5 + $0x10] sm:$0xff]  ;;  %v2757_v11 = vld [vmem:[%s3526_s5 + $0x18] sm:$0xff]  ;;  %v2762_v12 = vld [vmem:[%s3526_s5 + $0x20] sm:$0xff] }
   0x6   :  { %v2767_v13 = vld [vmem:[%s3526_s5 + $0x28] sm:$0xff]  ;;  %v2772_v14 = vld [vmem:[%s3526_s5 + $0x30] sm:$0xff]  ;;  %v2777_v15 = vld [vmem:[%s3526_s5 + $0x38] sm:$0xff] }
   0x7   :  { %153 = vsyncadd [#allocation5], 1024  ;;  %v2782_v16 = vld [vmem:[%s3530_s9] sm:$0xff]  ;;  %v2787_v17 = vld [vmem:[%s3530_s9 + $0x8] sm:$0xff] }
   0x8   :  { %v2792_v18 = vld [vmem:[%s3530_s9 + $0x10] sm:$0xff]  ;;  %v2797_v19 = vld [vmem:[%s3530_s9 + $0x18] sm:$0xff]  ;;  %v2802_v20 = vld [vmem:[%s3530_s9 + $0x20] sm:$0xff] }
   0x9   :  { %v2807_v21 = vld [vmem:[%s3530_s9 + $0x28] sm:$0xff]  ;;  %v2812_v22 = vld [vmem:[%s3530_s9 + $0x30] sm:$0xff]  ;;  %v2817_v23 = vld [vmem:[%s3530_s9 + $0x38] sm:$0xff] }
   0xa   :  { %209 = vsyncadd [#allocation7], 1024  ;;  %v2822_v24 = vld [vmem:[%s3525_s4] ss:$0 sm:$0xff]  ;;  %v2572_v26 = vld [vmem:[%s3524_s3 + $0x8] sm:$0xff]  }
   0xb   :  { %v2571_v25 = vld [vmem:[%s3524_s3] sm:$0xff]   ;;  %v2573_v27 = vld [vmem:[%s3524_s3 + $0x10] sm:$0xff]   ;;  %v2574_v28 = vld [vmem:[%s3524_s3 + $0x18] sm:$0xff]  }
   0xc   :  { %2330 = vmatprep.subr.bf16.mxu0 %v2571_v25  ;;  %v2579_v29 = vld [vmem:[%s3521_s0] sm:$0xff]   ;;  %v2576_v31 = vld [vmem:[%s3524_s3 + $0x28] sm:$0xff]   ;;  %v2577_v32 = vld [vmem:[%s3524_s3 + $0x30] sm:$0xff]  }
   0xd   :  { %2331 = vmatpush3.bf16.msra.mxu0 %v2571_v25  ;;  %2346 = vmatprep.mubr.bf16.mxu0 %v2579_v29  ;;  %v2575_v30 = vld [vmem:[%s3524_s3 + $0x20] sm:$0xff]   ;;  %v2578_v33 = vld [vmem:[%s3524_s3 + $0x38] sm:$0xff]   ;;  %v2580_v34 = vld [vmem:[%s3521_s0 + $0x8] sm:$0xff]  }
   0xe   :  { %2332 = vmatprep.subr.bf16.mxu0 %v2572_v26  ;;  %v2581_v35 = vld [vmem:[%s3521_s0 + $0x10] sm:$0xff]   ;;  %v2582_v36 = vld [vmem:[%s3521_s0 + $0x18] sm:$0xff]   ;;  %v2583_v37 = vld [vmem:[%s3521_s0 + $0x20] sm:$0xff]  }
   0xf   :  { %v2584_v38 = vld [vmem:[%s3521_s0 + $0x28] sm:$0xff]   ;;  %v2585_v39 = vld [vmem:[%s3521_s0 + $0x30] sm:$0xff]   ;;  %v2586_v40 = vld [vmem:[%s3521_s0 + $0x38] sm:$0xff]  }
  0x11   :  { %2333 = vmatpush3.bf16.msra.mxu0 %v2572_v26 }
  0x12   :  { %2334 = vmatprep.subr.bf16.mxu0 %v2573_v27 }
  0x15   :  { %2335 = vmatpush3.bf16.msra.mxu0 %v2573_v27 }
  0x16   :  { %2336 = vmatprep.subr.bf16.mxu0 %v2574_v28 }
  0x19   :  { %2337 = vmatpush3.bf16.msra.mxu0 %v2574_v28 }
  0x1a   :  { %2338 = vmatprep.subr.bf16.mxu0 %v2575_v30 }
  0x1d   :  { %2339 = vmatpush3.bf16.msra.mxu0 %v2575_v30 }
  0x1e   :  { %2340 = vmatprep.subr.bf16.mxu0 %v2576_v31 }
  0x21   :  { %2341 = vmatpush3.bf16.msra.mxu0 %v2576_v31 }
  0x22   :  { %2342 = vmatprep.subr.bf16.mxu0 %v2577_v32 }
  0x25   :  { %2343 = vmatpush3.bf16.msra.mxu0 %v2577_v32 }
  0x26   :  { %2344 = vmatprep.subr.bf16.mxu0 %v2578_v33 }
  0x29   :  { %2345 = vmatpush3.bf16.msra.mxu0 %v2578_v33 }
  0x2c   :  { %2347 = vmatmul.mubr.bf16.vlgmr.msra.gmra.mrb[0].mxu0 %v2580_v34 }
  0x2d   :  { %2350 = vmatprep.mubr.bf16.mxu0 %v2581_v35 }
  0x34   :  { %2351 = vmatmul.mubr.bf16.gmra.mrb[4].mxu0 %v2582_v36 }
  0x35   :  { %2354 = vmatprep.mubr.bf16.mxu0 %v2583_v37 }
  0x3c   :  { %2355 = vmatmul.mubr.bf16.gmra.mrb[8].mxu0 %v2584_v38 }
  0x3d   :  { %2358 = vmatprep.mubr.bf16.mxu0 %v2585_v39 }
  0x44   :  { %2359 = vmatmul.mubr.bf16.gmra.mrb[12].mxu0 %v2586_v40 }
  0xff   :  { %v2348_v41 = vpop.f32.mrb[0].mxu0 }
 0x100   :  { %v373_v42 = vpop.f32.mrb[1].mxu0 }
 0x101   :  { %v2349_v43 = vpop.f32.mrb[2].mxu0 }
 0x102   :  { %v437_v44 = vpack.c.bf16 %v2349_v43, %v2348_v41  ;;  %v376_v45 = vpop.f32.mrb[3].mxu0 }
 0x103   :  { %v436_v46 = vpack.c.bf16 %v376_v45, %v373_v42 }
 0x105   :  { %2362 = vmatprep.subr.bf16.mxu1 %v436_v46 }
 0x107   :  { %v2352_v47 = vpop.f32.mrb[4].mxu0 }
 0x108   :  { %v389_v48 = vpop.f32.mrb[5].mxu0 }
 0x109   :  { %v2353_v49 = vpop.f32.mrb[6].mxu0 }
 0x10a   :  { %v439_v50 = vpack.c.bf16 %v2353_v49, %v2352_v47  ;;  %v392_v51 = vpop.f32.mrb[7].mxu0 }
 0x10b   :  { %v438_v52 = vpack.c.bf16 %v392_v51, %v389_v48 }
 0x10f   :  { %v2356_v53 = vpop.f32.mrb[8].mxu0 }
 0x110   :  { %v405_v54 = vpop.f32.mrb[9].mxu0 }
 0x111   :  { %v2357_v55 = vpop.f32.mrb[10].mxu0 }
 0x112   :  { %v441_v56 = vpack.c.bf16 %v2357_v55, %v2356_v53  ;;  %v408_v57 = vpop.f32.mrb[11].mxu0 }
 0x113   :  { %v440_v58 = vpack.c.bf16 %v408_v57, %v405_v54 }
 0x117   :  { %v2360_v59 = vpop.f32.mrb[12].mxu0 }
 0x118   :  { %v421_v60 = vpop.f32.mrb[13].mxu0 }
 0x119   :  { %v2361_v61 = vpop.f32.mrb[14].mxu0 }
 0x11a   :  { %v443_v62 = vpack.c.bf16 %v2361_v61, %v2360_v59  ;;  %v424_v63 = vpop.f32.mrb[15].mxu0 }
 0x11b   :  { %v442_v25 = vpack.c.bf16 %v424_v63, %v421_v60 }
 0x11c   :  { %2617 = dma.done.wait [#allocation3], 1024 }
 0x11d   :  { %2618 = vsyncadd [#allocation3], 4294966272  ;;  %2378 = vmatprep.mubr.bf16.mxu1 %v2702_v0  ;;  %2363 = vmatpush3.bf16.msra.mxu1 %v436_v46  ;;  %v3536_v26 = vmov 0   ;;  %v2878_v27 = vld [vmem:[%s3529_s8] ss:$0 sm:$0xff]  ;;  %v458_v28 = vld [vmem:[%s3523_s2 + $0x10] sm:$0xff] }
 0x11e   :  { %2588 = vset.pattern.permute.xlu1 %v3536_v26  ;;  %2364 = vmatprep.subr.bf16.mxu1 %v437_v44  ;;  %v456_v0 = vld [vmem:[%s3523_s2] sm:$0xff]  ;;  %v459_v29 = vld [vmem:[%s3523_s2 + $0x18] sm:$0xff]  ;;  %v457_v30 = vld [vmem:[%s3523_s2 + $0x8] sm:$0xff]  ;;  %vm689_vm2 = vcmp.gt.f32.partialorder %v458_v28, 0.0 }
 0x11f   :  { %2587 = vset.pattern.permute.xlu0 %v3536_v26  ;;  %581 = vperm.xlu1 %2588, %v458_v28   ;;  %vm687_vm0 = vcmp.gt.f32.partialorder %v456_v0, 0.0  ;;  %vm688_vm1 = vcmp.gt.f32.partialorder %v457_v30, 0.0  ;;  %vm690_vm3 = vcmp.gt.f32.partialorder %v459_v29, 0.0  ;;  %v705_v34 = vsel %vm689_vm2, 1, %v3536_v26  ;;  %v461_v35 = vld [vmem:[%s3523_s2 + $0x28] sm:$0xff]  ;;  %v460_v36 = vld [vmem:[%s3523_s2 + $0x20] sm:$0xff] }
 0x120   :  { %571 = vperm.xlu0 %2587, %v456_v0   ;;  %v704_v31 = vsel %vm688_vm1, 1, %v3536_v26  ;;  %v703_v32 = vsel %vm687_vm0, 1, %v3536_v26  ;;  %v706_v33 = vsel %vm690_vm3, 1, %v3536_v26  ;;  %v463_v37 = vld [vmem:[%s3523_s2 + $0x38] sm:$0xff]  ;;  %v462_v38 = vld [vmem:[%s3523_s2 + $0x30] sm:$0xff]  ;;  %vm692_vm4 = vcmp.gt.f32.partialorder %v461_v35, 0.0 }
 0x121   :  { %2365 = vmatpush3.bf16.msra.mxu1 %v437_v44  ;;  %vm691_vm5 = vcmp.gt.f32.partialorder %v460_v36, 0.0  ;;  %v708_v39 = vsel %vm692_vm4, 1, %v3536_v26  ;;  %vm694_vm6 = vcmp.gt.f32.partialorder %v463_v37, 0.0  ;;  %vm693_vm7 = vcmp.gt.f32.partialorder %v462_v38, 0.0  ;;  %v465_v43 = vld [vmem:[%s3523_s2 + $0x48] sm:$0xff]  ;;  %v464_v44 = vld [vmem:[%s3523_s2 + $0x40] sm:$0xff] }
 0x122   :  { %2366 = vmatprep.subr.bf16.mxu1 %v438_v52  ;;  %v707_v40 = vsel %vm691_vm5, 1, %v3536_v26  ;;  %v710_v41 = vsel %vm694_vm6, 1, %v3536_v26  ;;  %v709_v42 = vsel %vm693_vm7, 1, %v3536_v26  ;;  %vm696_vm8 = vcmp.gt.f32.partialorder %v465_v43, 0.0  ;;  %v469_v47 = vld [vmem:[%s3523_s2 + $0x68] sm:$0xff]  ;;  %v468_v48 = vld [vmem:[%s3523_s2 + $0x60] sm:$0xff] }
 0x123   :  { %586 = vperm.xlu1 %2588, %v459_v29   ;;  %vm695_vm9 = vcmp.gt.f32.partialorder %v464_v44, 0.0  ;;  %v712_v45 = vsel %vm696_vm8, 1, %v3536_v26  ;;  %vm700_vm12 = vcmp.gt.f32.partialorder %v469_v47, 0.0  ;;  %vm699_vm13 = vcmp.gt.f32.partialorder %v468_v48, 0.0  ;;  %v2590_v53 = vld [vmem:[%s3528_s7 + $0x8] sm:$0xff]   ;;  %v2591_v54 = vld [vmem:[%s3528_s7 + $0x10] sm:$0xff]  }
 0x124   :  { %576 = vperm.xlu0 %2587, %v457_v30   ;;  %v716_v49 = vsel %vm700_vm12, 1, %v3536_v26  ;;  %v2592_v55 = vld [vmem:[%s3528_s7 + $0x18] sm:$0xff]   ;;  %v2594_v57 = vld [vmem:[%s3528_s7 + $0x28] sm:$0xff]  }
 0x125   :  { %2367 = vmatpush3.bf16.msra.mxu1 %v438_v52  ;;  %v2589_v52 = vld [vmem:[%s3528_s7] sm:$0xff]   ;;  %v2596_v59 = vld [vmem:[%s3528_s7 + $0x38] sm:$0xff]  }
 0x126   :  { %2368 = vmatprep.subr.bf16.mxu1 %v439_v50  ;;  %2394 = vmatprep.subr.bf16.mxu0 %v2589_v52 }
 0x127   :  { %723 = vperm.xlu1 %2588, %v704_v31   ;;  %2395 = vmatpush3.bf16.msra.mxu0 %v2589_v52 }
 0x128   :  { %720 = vperm.xlu0 %2587, %v703_v32   ;;  %2396 = vmatprep.subr.bf16.mxu0 %v2590_v53 }
 0x129   :  { %2369 = vmatpush3.bf16.msra.mxu1 %v439_v50  ;;  %v715_v50 = vsel %vm699_vm13, 1, %v3536_v26 }
 0x12a   :  { %2370 = vmatprep.subr.bf16.mxu1 %v440_v58 }
 0x12b   :  { %729 = vperm.xlu1 %2588, %v706_v33   ;;  %2397 = vmatpush3.bf16.msra.mxu0 %v2590_v53 }
 0x12c   :  { %726 = vperm.xlu0 %2587, %v705_v34   ;;  %2398 = vmatprep.subr.bf16.mxu0 %v2591_v54 }
 0x12d   :  { %2371 = vmatpush3.bf16.msra.mxu1 %v440_v58  ;;  %v2595_v58 = vld [vmem:[%s3528_s7 + $0x30] sm:$0xff]  }
 0x12e   :  { %2372 = vmatprep.subr.bf16.mxu1 %v441_v56 }
 0x12f   :  { %596 = vperm.xlu1 %2588, %v461_v35   ;;  %2399 = vmatpush3.bf16.msra.mxu0 %v2591_v54 }
 0x130   :  { %591 = vperm.xlu0 %2587, %v460_v36   ;;  %2400 = vmatprep.subr.bf16.mxu0 %v2592_v55 }
 0x131   :  { %2373 = vmatpush3.bf16.msra.mxu1 %v441_v56  ;;  %v2593_v56 = vld [vmem:[%s3528_s7 + $0x20] sm:$0xff]  }
 0x132   :  { %2374 = vmatprep.subr.bf16.mxu1 %v442_v25 }
 0x133   :  { %606 = vperm.xlu1 %2588, %v463_v37   ;;  %2401 = vmatpush3.bf16.msra.mxu0 %v2592_v55 }
 0x134   :  { %601 = vperm.xlu0 %2587, %v462_v38   ;;  %2402 = vmatprep.subr.bf16.mxu0 %v2593_v56 }
 0x135   :  { %2375 = vmatpush3.bf16.msra.mxu1 %v442_v25 }
 0x136   :  { %2376 = vmatprep.subr.bf16.mxu1 %v443_v62 }
 0x137   :  { %735 = vperm.xlu1 %2588, %v708_v39   ;;  %2403 = vmatpush3.bf16.msra.mxu0 %v2593_v56 }
 0x138   :  { %732 = vperm.xlu0 %2587, %v707_v40   ;;  %2404 = vmatprep.subr.bf16.mxu0 %v2594_v57 }
 0x139   :  { %2377 = vmatpush3.bf16.msra.mxu1 %v443_v62 }
 0x13b   :  { %741 = vperm.xlu1 %2588, %v710_v41   ;;  %2405 = vmatpush3.bf16.msra.mxu0 %v2594_v57 }
 0x13c   :  { %2379 = vmatmul.mubr.bf16.vlgmr.msra.gmra.mrb[0].mxu1 %v2707_v1  ;;  %738 = vperm.xlu0 %2587, %v709_v42   ;;  %v467_v1 = vld [vmem:[%s3523_s2 + $0x58] sm:$0xff] }
 0x13d   :  { %2382 = vmatprep.mubr.bf16.mxu1 %v2712_v2  ;;  %v466_v2 = vld [vmem:[%s3523_s2 + $0x50] sm:$0xff]  ;;  %vm698_vm10 = vcmp.gt.f32.partialorder %v467_v1, 0.0  ;;  %2406 = vmatprep.subr.bf16.mxu0 %v2595_v58 }
 0x13e   :  { %vm697_vm11 = vcmp.gt.f32.partialorder %v466_v2, 0.0 }
 0x13f   :  { %616 = vperm.xlu1 %2588, %v465_v43   ;;  %v713_v46 = vsel %vm697_vm11, 1, %v3536_v26  ;;  %2407 = vmatpush3.bf16.msra.mxu0 %v2595_v58 }
 0x140   :  { %611 = vperm.xlu0 %2587, %v464_v44   ;;  %2408 = vmatprep.subr.bf16.mxu0 %v2596_v59 }
 0x143   :  { %626 = vperm.xlu1 %2588, %v467_v1   ;;  %2409 = vmatpush3.bf16.msra.mxu0 %v2596_v59 }
 0x144   :  { %2383 = vmatmul.mubr.bf16.gmra.mrb[4].mxu1 %v2717_v3  ;;  %621 = vperm.xlu0 %2587, %v466_v2   ;;  %v711_v3 = vsel %vm695_vm9, 1, %v3536_v26 }
 0x145   :  { %2386 = vmatprep.mubr.bf16.mxu1 %v2722_v4  ;;  %v714_v4 = vsel %vm698_vm10, 1, %v3536_v26 }
 0x147   :  { %747 = vperm.xlu1 %2588, %v712_v45  }
 0x148   :  { %744 = vperm.xlu0 %2587, %v711_v3  }
 0x14b   :  { %753 = vperm.xlu1 %2588, %v714_v4  }
 0x14c   :  { %2387 = vmatmul.mubr.bf16.gmra.mrb[8].mxu1 %v2727_v5  ;;  %750 = vperm.xlu0 %2587, %v713_v46   ;;  %v471_v5 = vld [vmem:[%s3523_s2 + $0x78] sm:$0xff] }
 0x14d   :  { %2390 = vmatprep.mubr.bf16.mxu1 %v2732_v6  ;;  %v470_v6 = vld [vmem:[%s3523_s2 + $0x70] sm:$0xff]  ;;  %vm702_vm14 = vcmp.gt.f32.partialorder %v471_v5, 0.0 }
 0x14e   :  { %vm701_vm15 = vcmp.gt.f32.partialorder %v470_v6, 0.0 }
 0x14f   :  { %636 = vperm.xlu1 %2588, %v469_v47   ;;  %v717_v51 = vsel %vm701_vm15, 1, %v3536_v26 }
 0x150   :  { %631 = vperm.xlu0 %2587, %v468_v48  }
 0x153   :  { %646 = vperm.xlu1 %2588, %v471_v5  }
 0x154   :  { %2391 = vmatmul.mubr.bf16.gmra.mrb[12].mxu1 %v2737_v7  ;;  %641 = vperm.xlu0 %2587, %v470_v6   ;;  %v718_v7 = vsel %vm702_vm14, 1, %v3536_v26 }
 0x157   :  { %759 = vperm.xlu1 %2588, %v716_v49  }
 0x158   :  { %756 = vperm.xlu0 %2587, %v715_v50  }
 0x15b   :  { %765 = vperm.xlu1 %2588, %v718_v7  }
 0x15c   :  { %762 = vperm.xlu0 %2587, %v717_v51  }
 0x19e   :  { %v582_v61 = vpop.permute.xlu1 %581 }
 0x19f   :  { %v572_v60 = vpop.permute.xlu0 %571 }
 0x1a2   :  { %v587_v63 = vpop.permute.xlu1 %586 }
 0x1a3   :  { %v577_v62 = vpop.permute.xlu0 %576 }
 0x1a6   :  { %v724_v28 = vpop.permute.xlu1 %723 }
 0x1a7   :  { %v721_v25 = vpop.permute.xlu0 %720  ;;  %vm768_vm3 = vcmp.eq.s32.totalorder %v724_v28, 1 }
 0x1a8   :  { %vm767_vm1 = vcmp.eq.s32.totalorder %v721_v25, 1 }
 0x1aa   :  { %v730_v29 = vpop.permute.xlu1 %729 }
 0x1ab   :  { %v727_v0 = vpop.permute.xlu0 %726  ;;  %vm770_vm2 = vcmp.eq.s32.totalorder %v730_v29, 1 }
 0x1ac   :  { %vm769_vm0 = vcmp.eq.s32.totalorder %v727_v0, 1 }
 0x1ae   :  { %v597_v31 = vpop.permute.xlu1 %596 }
 0x1af   :  { %v592_v30 = vpop.permute.xlu0 %591 }
 0x1b2   :  { %v607_v33 = vpop.permute.xlu1 %606 }
 0x1b3   :  { %v602_v32 = vpop.permute.xlu0 %601 }
 0x1b6   :  { %v2975_v35 = vpop.permute.xlu1 %735 }
 0x1b7   :  { %v733_v34 = vpop.permute.xlu0 %732  ;;  %vm772_vm7 = vcmp.eq.s32.totalorder %v2975_v35, 1 }
 0x1b8   :  { %vm771_vm5 = vcmp.eq.s32.totalorder %v733_v34, 1 }
 0x1ba   :  { %v742_v37 = vpop.permute.xlu1 %741 }
 0x1bb   :  { %v739_v36 = vpop.permute.xlu0 %738  ;;  %vm774_vm6 = vcmp.eq.s32.totalorder %v742_v37, 1 }
 0x1bc   :  { %vm773_vm4 = vcmp.eq.s32.totalorder %v739_v36, 1 }
 0x1be   :  { %v2979_v39 = vpop.permute.xlu1 %616 }
 0x1bf   :  { %v2977_v38 = vpop.permute.xlu0 %611 }
 0x1c2   :  { %v2983_v41 = vpop.permute.xlu1 %626 }
 0x1c3   :  { %v2981_v40 = vpop.permute.xlu0 %621 }
 0x1c6   :  { %v2987_v43 = vpop.permute.xlu1 %747 }
 0x1c7   :  { %v2985_v42 = vpop.permute.xlu0 %744  ;;  %vm776_vm11 = vcmp.eq.s32.totalorder %v2987_v43, 1 }
 0x1c8   :  { %vm775_vm9 = vcmp.eq.s32.totalorder %v2985_v42, 1 }
 0x1ca   :  { %v2991_v46 = vpop.permute.xlu1 %753 }
 0x1cb   :  { %v2989_v1 = vpop.permute.xlu0 %750  ;;  %vm778_vm10 = vcmp.eq.s32.totalorder %v2991_v46, 1 }
 0x1cc   :  { %vm777_vm8 = vcmp.eq.s32.totalorder %v2989_v1, 1 }
 0x1ce   :  { %v2999_v59 = vpop.permute.xlu1 %636 }
 0x1cf   :  { %v2997_v53 = vpop.permute.xlu0 %631 }
 0x20f   :  { %v2380_v44 = vpop.f32.mrb[0].mxu1 }
 0x210   :  { %v651_v2 = vmul.f32 %v2380_v44, %v582_v61  ;;  %v506_v45 = vpop.f32.mrb[1].mxu1 }
 0x211   :  { %v649_v3 = vmul.f32 %v572_v60, %v506_v45  ;;  %v2381_v4 = vpop.f32.mrb[2].mxu1 }
 0x212   :  { %v673_v47 = vadd.f32 %v2822_v24, %v651_v2  ;;  %v652_v48 = vmul.f32 %v2381_v4, %v587_v63  ;;  %v509_v5 = vpop.f32.mrb[3].mxu1 }
 0x213   :  { %v671_v6 = vadd.f32 %v2822_v24, %v649_v3  ;;  %v650_v49 = vmul.f32 %v577_v62, %v509_v5 }
 0x214   :  { %v785_v50 = vsel %vm769_vm0, %v673_v47, 0.0  ;;  %v674_v7 = vadd.f32 %v2822_v24, %v652_v48  ;;  %v642_v47 = vpop.permute.xlu0 %641 }
 0x215   :  { %v672_v51 = vadd.f32 %v2822_v24, %v650_v49  ;;  %v783_v52 = vsel %vm767_vm1, %v671_v6, 0.0  ;;  %v801_v55 = vmax.f32 %v785_v50, 0.0 }
 0x216   :  { %v786_v54 = vsel %vm770_vm2, %v674_v7, 0.0  ;;  %v799_v62 = vmax.f32 %v783_v52, 0.0 }
 0x217   :  { %v802_v56 = vmax.f32 %v786_v54, 0.0  ;;  %v2384_v57 = vpop.f32.mrb[4].mxu1  ;;  %v784_v58 = vsel %vm768_vm3, %v672_v51, 0.0 }
 0x218   :  { %v655_v60 = vmul.f32 %v2384_v57, %v602_v32  ;;  %v522_v61 = vpop.f32.mrb[5].mxu1  ;;  %v800_v63 = vmax.f32 %v784_v58, 0.0 }
 0x219   :  { %v653_v25 = vmul.f32 %v592_v30, %v522_v61  ;;  %v2385_v0 = vpop.f32.mrb[6].mxu1  ;;  %v817_v29 = vpack.c.bf16 %v802_v56, %v801_v55  ;;  %v757_v56 = vpop.permute.xlu0 %756 }
 0x21a   :  { %v677_v44 = vadd.f32 %v2822_v24, %v655_v60  ;;  %v656_v2 = vmul.f32 %v2385_v0, %v607_v33  ;;  %v525_v28 = vpop.f32.mrb[7].mxu1  ;;  %v816_v45 = vpack.c.bf16 %v800_v63, %v799_v62  ;;  %v647_v33 = vpop.permute.xlu1 %646  ;;  %vm779_vm13 = vcmp.eq.s32.totalorder %v757_v56, 1 }
 0x21b   :  { %v675_v3 = vadd.f32 %v2822_v24, %v653_v25  ;;  %v654_v4 = vmul.f32 %v597_v31, %v525_v28 }
 0x21c   :  { %v789_v48 = vsel %vm773_vm4, %v677_v44, 0.0  ;;  %v678_v32 = vadd.f32 %v2822_v24, %v656_v2  ;;  %2410 = vmatprep.mubr.bf16.mxu0 %v816_v45 }
 0x21d   :  { %v787_v5 = vsel %vm771_vm5, %v675_v3, 0.0  ;;  %v676_v30 = vadd.f32 %v2822_v24, %v654_v4  ;;  %2411 = vmatmul.mubr.bf16.vlgmr.msra.gmra.mrb[16].mxu0 %v817_v29  ;;  %v805_v49 = vmax.f32 %v789_v48, 0.0  ;;  %v763_v2 = vpop.permute.xlu0 %762 }
 0x21e   :  { %v790_v6 = vsel %vm774_vm6, %v678_v32, 0.0  ;;  %v803_v31 = vmax.f32 %v787_v5, 0.0  ;;  %vm781_vm12 = vcmp.eq.s32.totalorder %v763_v2, 1 }
 0x21f   :  { %v806_v36 = vmax.f32 %v790_v6, 0.0  ;;  %v788_v50 = vsel %vm772_vm7, %v676_v30, 0.0  ;;  %v2388_v7 = vpop.f32.mrb[8].mxu1 }
 0x220   :  { %v804_v34 = vmax.f32 %v788_v50, 0.0  ;;  %v659_v51 = vmul.f32 %v2388_v7, %v2981_v40  ;;  %v538_v52 = vpop.f32.mrb[9].mxu1  ;;  %v760_v40 = vpop.permute.xlu1 %759 }
 0x221   :  { %v657_v54 = vmul.f32 %v2977_v38, %v538_v52  ;;  %v2389_v37 = vpop.f32.mrb[10].mxu1  ;;  %v819_v55 = vpack.c.bf16 %v806_v36, %v805_v49  ;;  %vm780_vm15 = vcmp.eq.s32.totalorder %v760_v40, 1 }
 0x222   :  { %v681_v57 = vadd.f32 %v2822_v24, %v659_v51  ;;  %v660_v35 = vmul.f32 %v2389_v37, %v2983_v41  ;;  %v541_v58 = vpop.f32.mrb[11].mxu1  ;;  %v818_v60 = vpack.c.bf16 %v804_v34, %v803_v31 }
 0x223   :  { %v679_v61 = vadd.f32 %v2822_v24, %v657_v54  ;;  %v658_v62 = vmul.f32 %v2979_v39, %v541_v58 }
 0x224   :  { %v793_v63 = vsel %vm777_vm8, %v681_v57, 0.0  ;;  %v682_v38 = vadd.f32 %v2822_v24, %v660_v35  ;;  %2414 = vmatprep.mubr.bf16.mxu0 %v818_v60  ;;  %v766_v32 = vpop.permute.xlu1 %765 }
 0x225   :  { %v791_v25 = vsel %vm775_vm9, %v679_v61, 0.0  ;;  %v680_v41 = vadd.f32 %v2822_v24, %v658_v62  ;;  %2415 = vmatmul.mubr.bf16.gmra.mrb[20].mxu0 %v819_v55  ;;  %v809_v0 = vmax.f32 %v793_v63, 0.0  ;;  %vm782_vm14 = vcmp.eq.s32.totalorder %v766_v32, 1 }
 0x226   :  { %v794_v1 = vsel %vm778_vm10, %v682_v38, 0.0  ;;  %v807_v42 = vmax.f32 %v791_v25, 0.0 }
 0x227   :  { %v810_v29 = vmax.f32 %v794_v1, 0.0  ;;  %v792_v44 = vsel %vm776_vm11, %v680_v41, 0.0  ;;  %v2392_v39 = vpop.f32.mrb[12].mxu1 }
 0x228   :  { %v808_v28 = vmax.f32 %v792_v44, 0.0  ;;  %v663_v45 = vmul.f32 %v2392_v39, %v642_v47  ;;  %v554_v3 = vpop.f32.mrb[13].mxu1 }
 0x229   :  { %v661_v4 = vmul.f32 %v2997_v53, %v554_v3  ;;  %v2393_v48 = vpop.f32.mrb[14].mxu1  ;;  %v821_v46 = vpack.c.bf16 %v810_v29, %v809_v0 }
 0x22a   :  { %v685_v5 = vadd.f32 %v2822_v24, %v663_v45  ;;  %v664_v30 = vmul.f32 %v2393_v48, %v647_v33  ;;  %v557_v6 = vpop.f32.mrb[15].mxu1  ;;  %v820_v43 = vpack.c.bf16 %v808_v28, %v807_v42 }
 0x22b   :  { %v683_v49 = vadd.f32 %v2822_v24, %v661_v4  ;;  %v662_v36 = vmul.f32 %v2999_v59, %v557_v6 }
 0x22c   :  { %v797_v50 = vsel %vm781_vm12, %v685_v5, 0.0  ;;  %v686_v47 = vadd.f32 %v2822_v24, %v664_v30  ;;  %2418 = vmatprep.mubr.bf16.mxu0 %v820_v43 }
 0x22d   :  { %v795_v53 = vsel %vm779_vm13, %v683_v49, 0.0  ;;  %v684_v7 = vadd.f32 %v2822_v24, %v662_v36  ;;  %2419 = vmatmul.mubr.bf16.gmra.mrb[24].mxu0 %v821_v46  ;;  %v813_v33 = vmax.f32 %v797_v50, 0.0 }
 0x22e   :  { %v798_v31 = vsel %vm782_vm14, %v686_v47, 0.0  ;;  %v811_v52 = vmax.f32 %v795_v53, 0.0 }
 0x22f   :  { %v814_v34 = vmax.f32 %v798_v31, 0.0  ;;  %v796_v51 = vsel %vm780_vm15, %v684_v7, 0.0 }
 0x230   :  { %v812_v54 = vmax.f32 %v796_v51, 0.0 }
 0x231   :  { %v823_v37 = vpack.c.bf16 %v814_v34, %v813_v33 }
 0x232   :  { %v822_v55 = vpack.c.bf16 %v812_v54, %v811_v52 }
 0x234   :  { %2422 = vmatprep.mubr.bf16.mxu0 %v822_v55 }
 0x235   :  { %2423 = vmatmul.mubr.bf16.gmra.mrb[28].mxu0 %v823_v37 }
 0x2f0   :  { %v2412_v59 = vpop.f32.mrb[16].mxu0 }
 0x2f1   :  { %v922_v56 = vpop.f32.mrb[17].mxu0 }
 0x2f2   :  { %v2413_v57 = vpop.f32.mrb[18].mxu0 }
 0x2f3   :  { %v986_v35 = vpack.c.bf16 %v2413_v57, %v2412_v59  ;;  %v925_v58 = vpop.f32.mrb[19].mxu0 }
 0x2f4   :  { %v985_v60 = vpack.c.bf16 %v925_v58, %v922_v56 }
 0x2f6   :  { %2426 = vmatprep.subr.bf16.mxu1 %v985_v60 }
 0x2f8   :  { %v2416_v61 = vpop.f32.mrb[20].mxu0 }
 0x2f9   :  { %v938_v24 = vpop.f32.mrb[21].mxu0 }
 0x2fa   :  { %v2417_v62 = vpop.f32.mrb[22].mxu0 }
 0x2fb   :  { %v988_v40 = vpack.c.bf16 %v2417_v62, %v2416_v61  ;;  %v941_v63 = vpop.f32.mrb[23].mxu0 }
 0x2fc   :  { %v987_v38 = vpack.c.bf16 %v941_v63, %v938_v24 }
 0x300   :  { %v2420_v25 = vpop.f32.mrb[24].mxu0 }
 0x301   :  { %v954_v41 = vpop.f32.mrb[25].mxu0 }
 0x302   :  { %v2421_v1 = vpop.f32.mrb[26].mxu0 }
 0x303   :  { %v990_v0 = vpack.c.bf16 %v2421_v1, %v2420_v25  ;;  %v957_v29 = vpop.f32.mrb[27].mxu0 }
 0x304   :  { %v989_v44 = vpack.c.bf16 %v957_v29, %v954_v41 }
 0x308   :  { %v2424_v39 = vpop.f32.mrb[28].mxu0 }
 0x309   :  { %v970_v2 = vpop.f32.mrb[29].mxu0 }
 0x30a   :  { %v2425_v42 = vpop.f32.mrb[30].mxu0 }
 0x30b   :  { %v992_v28 = vpack.c.bf16 %v2425_v42, %v2424_v39  ;;  %v973_v45 = vpop.f32.mrb[31].mxu0 }
 0x30c   :  { %v991_v3 = vpack.c.bf16 %v973_v45, %v970_v2 }
 0x30d   :  { %2619 = dma.done.wait [#allocation5], 1024 }
 0x30e   :  { %2620 = vsyncadd [#allocation5], 4294966272  ;;  %2598 = vset.pattern.permute.xlu1 %v3536_v26  ;;  %2427 = vmatpush3.bf16.msra.mxu1 %v985_v60  ;;  %v3030_v4 = vld [vmem:[%s3534_s13] ss:$0 sm:$0xff]  ;;  %v1005_v48 = vld [vmem:[%s3527_s6 + $0x10] sm:$0xff] }
 0x30f   :  { %2597 = vset.pattern.permute.xlu0 %v3536_v26  ;;  %2428 = vmatprep.subr.bf16.mxu1 %v986_v35  ;;  %v1003_v46 = vld [vmem:[%s3527_s6] sm:$0xff]  ;;  %v1004_v32 = vld [vmem:[%s3527_s6 + $0x8] sm:$0xff]  ;;  %vm1236_vm2 = vcmp.gt.f32.partialorder %v1005_v48, 0.0  ;;  %v1010_v50 = vld [vmem:[%s3527_s6 + $0x38] sm:$0xff] }
 0x310   :  { %2442 = vmatprep.mubr.bf16.mxu1 %v2742_v8  ;;  %1128 = vperm.xlu1 %2598, %v1005_v48   ;;  %v1006_v8 = vld [vmem:[%s3527_s6 + $0x18] sm:$0xff]  ;;  %vm1234_vm0 = vcmp.gt.f32.partialorder %v1003_v46, 0.0  ;;  %vm1235_vm1 = vcmp.gt.f32.partialorder %v1004_v32, 0.0  ;;  %v1252_v43 = vsel %vm1236_vm2, 1, %v3536_v26  ;;  %v1008_v49 = vld [vmem:[%s3527_s6 + $0x28] sm:$0xff]  ;;  %v1007_v36 = vld [vmem:[%s3527_s6 + $0x20] sm:$0xff] }
 0x311   :  { %1118 = vperm.xlu0 %2597, %v1003_v46   ;;  %v1251_v5 = vsel %vm1235_vm1, 1, %v3536_v26  ;;  %v1250_v30 = vsel %vm1234_vm0, 1, %v3536_v26  ;;  %vm1237_vm3 = vcmp.gt.f32.partialorder %v1006_v8, 0.0  ;;  %v1009_v47 = vld [vmem:[%s3527_s6 + $0x30] sm:$0xff]  ;;  %vm1239_vm4 = vcmp.gt.f32.partialorder %v1008_v49, 0.0  ;;  %v1012_v34 = vld [vmem:[%s3527_s6 + $0x48] sm:$0xff] }
 0x312   :  { %2429 = vmatpush3.bf16.msra.mxu1 %v986_v35  ;;  %v1253_v6 = vsel %vm1237_vm3, 1, %v3536_v26  ;;  %vm1238_vm5 = vcmp.gt.f32.partialorder %v1007_v36, 0.0  ;;  %v1255_v53 = vsel %vm1239_vm4, 1, %v3536_v26  ;;  %vm1241_vm6 = vcmp.gt.f32.partialorder %v1010_v50, 0.0  ;;  %v1011_v51 = vld [vmem:[%s3527_s6 + $0x40] sm:$0xff]  ;;  %v1016_v37 = vld [vmem:[%s3527_s6 + $0x68] sm:$0xff] }
 0x313   :  { %2430 = vmatprep.subr.bf16.mxu1 %v987_v38  ;;  %v1254_v7 = vsel %vm1238_vm5, 1, %v3536_v26  ;;  %vm1240_vm7 = vcmp.gt.f32.partialorder %v1009_v47, 0.0  ;;  %v1257_v31 = vsel %vm1241_vm6, 1, %v3536_v26  ;;  %vm1243_vm8 = vcmp.gt.f32.partialorder %v1012_v34, 0.0  ;;  %v1015_v55 = vld [vmem:[%s3527_s6 + $0x60] sm:$0xff]  ;;  %v2600_v58 = vld [vmem:[%s3533_s12 + $0x8] sm:$0xff]  }
 0x314   :  { %1133 = vperm.xlu1 %2598, %v1006_v8   ;;  %v1256_v33 = vsel %vm1240_vm7, 1, %v3536_v26  ;;  %vm1242_vm9 = vcmp.gt.f32.partialorder %v1011_v51, 0.0  ;;  %v1259_v52 = vsel %vm1243_vm8, 1, %v3536_v26  ;;  %vm1247_vm12 = vcmp.gt.f32.partialorder %v1016_v37, 0.0  ;;  %v2599_v35 = vld [vmem:[%s3533_s12] sm:$0xff]   ;;  %v2601_v60 = vld [vmem:[%s3533_s12 + $0x10] sm:$0xff]  }
 0x315   :  { %1123 = vperm.xlu0 %2597, %v1004_v32   ;;  %vm1246_vm13 = vcmp.gt.f32.partialorder %v1015_v55, 0.0  ;;  %v1263_v59 = vsel %vm1247_vm12, 1, %v3536_v26  ;;  %2458 = vmatprep.subr.bf16.mxu0 %v2599_v35  ;;  %v2602_v61 = vld [vmem:[%s3533_s12 + $0x18] sm:$0xff]   ;;  %v2603_v24 = vld [vmem:[%s3533_s12 + $0x20] sm:$0xff]   ;;  %v2604_v62 = vld [vmem:[%s3533_s12 + $0x28] sm:$0xff]  }
 0x316   :  { %2431 = vmatpush3.bf16.msra.mxu1 %v987_v38  ;;  %v1262_v56 = vsel %vm1246_vm13, 1, %v3536_v26  ;;  %2459 = vmatpush3.bf16.msra.mxu0 %v2599_v35  ;;  %v2606_v63 = vld [vmem:[%s3533_s12 + $0x38] sm:$0xff]   ;;  %v3130_v38 = vld [vmem:[%s3532_s11] sm:$0xff]  }
 0x317   :  { %2432 = vmatprep.subr.bf16.mxu1 %v988_v40  ;;  %2460 = vmatprep.subr.bf16.mxu0 %v2600_v58 }
 0x318   :  { %1270 = vperm.xlu1 %2598, %v1251_v5  }
 0x319   :  { %1267 = vperm.xlu0 %2597, %v1250_v30  }
 0x31a   :  { %2433 = vmatpush3.bf16.msra.mxu1 %v988_v40  ;;  %2461 = vmatpush3.bf16.msra.mxu0 %v2600_v58  ;;  %v2605_v40 = vld [vmem:[%s3533_s12 + $0x30] sm:$0xff]  }
 0x31b   :  { %2434 = vmatprep.subr.bf16.mxu1 %v989_v44  ;;  %2462 = vmatprep.subr.bf16.mxu0 %v2601_v60 }
 0x31c   :  { %1276 = vperm.xlu1 %2598, %v1253_v6  }
 0x31d   :  { %1273 = vperm.xlu0 %2597, %v1252_v43  }
 0x31e   :  { %2435 = vmatpush3.bf16.msra.mxu1 %v989_v44  ;;  %2463 = vmatpush3.bf16.msra.mxu0 %v2601_v60 }
 0x31f   :  { %2436 = vmatprep.subr.bf16.mxu1 %v990_v0  ;;  %2464 = vmatprep.subr.bf16.mxu0 %v2602_v61 }
 0x320   :  { %1143 = vperm.xlu1 %2598, %v1008_v49  }
 0x321   :  { %1138 = vperm.xlu0 %2597, %v1007_v36  }
 0x322   :  { %2437 = vmatpush3.bf16.msra.mxu1 %v990_v0  ;;  %2465 = vmatpush3.bf16.msra.mxu0 %v2602_v61 }
 0x323   :  { %2438 = vmatprep.subr.bf16.mxu1 %v991_v3  ;;  %2466 = vmatprep.subr.bf16.mxu0 %v2603_v24 }
 0x324   :  { %1153 = vperm.xlu1 %2598, %v1010_v50  }
 0x325   :  { %1148 = vperm.xlu0 %2597, %v1009_v47  }
 0x326   :  { %2439 = vmatpush3.bf16.msra.mxu1 %v991_v3  ;;  %2467 = vmatpush3.bf16.msra.mxu0 %v2603_v24 }
 0x327   :  { %2440 = vmatprep.subr.bf16.mxu1 %v992_v28  ;;  %2468 = vmatprep.subr.bf16.mxu0 %v2604_v62 }
 0x328   :  { %1282 = vperm.xlu1 %2598, %v1255_v53  }
 0x329   :  { %1279 = vperm.xlu0 %2597, %v1254_v7  }
 0x32a   :  { %2441 = vmatpush3.bf16.msra.mxu1 %v992_v28  ;;  %2469 = vmatpush3.bf16.msra.mxu0 %v2604_v62 }
 0x32b   :  { %2470 = vmatprep.subr.bf16.mxu0 %v2605_v40 }
 0x32c   :  { %1288 = vperm.xlu1 %2598, %v1257_v31  }
 0x32d   :  { %2443 = vmatmul.mubr.bf16.vlgmr.msra.gmra.mrb[16].mxu1 %v2747_v9  ;;  %1285 = vperm.xlu0 %2597, %v1256_v33   ;;  %v1014_v9 = vld [vmem:[%s3527_s6 + $0x58] sm:$0xff] }
 0x32e   :  { %2446 = vmatprep.mubr.bf16.mxu1 %v2752_v10  ;;  %v1013_v10 = vld [vmem:[%s3527_s6 + $0x50] sm:$0xff]  ;;  %vm1245_vm10 = vcmp.gt.f32.partialorder %v1014_v9, 0.0  ;;  %2471 = vmatpush3.bf16.msra.mxu0 %v2605_v40 }
 0x32f   :  { %vm1244_vm11 = vcmp.gt.f32.partialorder %v1013_v10, 0.0  ;;  %2472 = vmatprep.subr.bf16.mxu0 %v2606_v63 }
 0x330   :  { %1163 = vperm.xlu1 %2598, %v1012_v34   ;;  %v1260_v54 = vsel %vm1244_vm11, 1, %v3536_v26 }
 0x331   :  { %1158 = vperm.xlu0 %2597, %v1011_v51  }
 0x332   :  { %2473 = vmatpush3.bf16.msra.mxu0 %v2606_v63 }
 0x333   :  { %2490 = vmatprep.subr.bf16.mxu0 %v3130_v38 }
 0x334   :  { %1173 = vperm.xlu1 %2598, %v1014_v9  }
 0x335   :  { %2447 = vmatmul.mubr.bf16.gmra.mrb[20].mxu1 %v2757_v11  ;;  %1168 = vperm.xlu0 %2597, %v1013_v10   ;;  %v1258_v11 = vsel %vm1242_vm9, 1, %v3536_v26 }
 0x336   :  { %2450 = vmatprep.mubr.bf16.mxu1 %v2762_v12  ;;  %v1261_v12 = vsel %vm1245_vm10, 1, %v3536_v26 }
 0x338   :  { %1294 = vperm.xlu1 %2598, %v1259_v52  }
 0x339   :  { %1291 = vperm.xlu0 %2597, %v1258_v11  }
 0x33c   :  { %1300 = vperm.xlu1 %2598, %v1261_v12  }
 0x33d   :  { %2451 = vmatmul.mubr.bf16.gmra.mrb[24].mxu1 %v2767_v13  ;;  %1297 = vperm.xlu0 %2597, %v1260_v54   ;;  %v1018_v13 = vld [vmem:[%s3527_s6 + $0x78] sm:$0xff] }
 0x33e   :  { %2454 = vmatprep.mubr.bf16.mxu1 %v2772_v14  ;;  %v1017_v14 = vld [vmem:[%s3527_s6 + $0x70] sm:$0xff]  ;;  %vm1249_vm14 = vcmp.gt.f32.partialorder %v1018_v13, 0.0 }
 0x33f   :  { %vm1248_vm15 = vcmp.gt.f32.partialorder %v1017_v14, 0.0 }
 0x340   :  { %1183 = vperm.xlu1 %2598, %v1016_v37   ;;  %v1264_v57 = vsel %vm1248_vm15, 1, %v3536_v26 }
 0x341   :  { %1178 = vperm.xlu0 %2597, %v1015_v55  }
 0x344   :  { %1193 = vperm.xlu1 %2598, %v1018_v13  }
 0x345   :  { %2455 = vmatmul.mubr.bf16.gmra.mrb[28].mxu1 %v2777_v15  ;;  %1188 = vperm.xlu0 %2597, %v1017_v14   ;;  %v1265_v15 = vsel %vm1249_vm14, 1, %v3536_v26 }
 0x348   :  { %1306 = vperm.xlu1 %2598, %v1263_v59  }
 0x349   :  { %1303 = vperm.xlu0 %2597, %v1262_v56  }
 0x34c   :  { %1312 = vperm.xlu1 %2598, %v1265_v15  }
 0x34d   :  { %1309 = vperm.xlu0 %2597, %v1264_v57  }
 0x38f   :  { %v1129_v41 = vpop.permute.xlu1 %1128 }
 0x390   :  { %v1119_v25 = vpop.permute.xlu0 %1118 }
 0x393   :  { %v1134_v0 = vpop.permute.xlu1 %1133 }
 0x394   :  { %v1124_v1 = vpop.permute.xlu0 %1123 }
 0x397   :  { %v3135_v44 = vpop.permute.xlu1 %1270 }
 0x398   :  { %v3133_v29 = vpop.permute.xlu0 %1267  ;;  %vm1315_vm3 = vcmp.eq.s32.totalorder %v3135_v44, 1 }
 0x399   :  { %vm1314_vm1 = vcmp.eq.s32.totalorder %v3133_v29, 1 }
 0x39b   :  { %v3139_v2 = vpop.permute.xlu1 %1276 }
 0x39c   :  { %v3137_v39 = vpop.permute.xlu0 %1273  ;;  %vm1317_vm2 = vcmp.eq.s32.totalorder %v3139_v2, 1 }
 0x39d   :  { %vm1316_vm0 = vcmp.eq.s32.totalorder %v3137_v39, 1 }
 0x39f   :  { %v1144_v28 = vpop.permute.xlu1 %1143 }
 0x3a0   :  { %v1139_v42 = vpop.permute.xlu0 %1138 }
 0x3a3   :  { %v1154_v3 = vpop.permute.xlu1 %1153 }
 0x3a4   :  { %v1149_v45 = vpop.permute.xlu0 %1148 }
 0x3a7   :  { %v3143_v46 = vpop.permute.xlu1 %1282 }
 0x3a8   :  { %v3141_v48 = vpop.permute.xlu0 %1279  ;;  %vm1319_vm7 = vcmp.eq.s32.totalorder %v3143_v46, 1 }
 0x3a9   :  { %vm1318_vm5 = vcmp.eq.s32.totalorder %v3141_v48, 1 }
 0x3ab   :  { %v3147_v32 = vpop.permute.xlu1 %1288 }
 0x3ac   :  { %v3145_v8 = vpop.permute.xlu0 %1285  ;;  %vm1321_vm6 = vcmp.eq.s32.totalorder %v3147_v32, 1 }
 0x3ad   :  { %vm1320_vm4 = vcmp.eq.s32.totalorder %v3145_v8, 1 }
 0x3af   :  { %v3151_v30 = vpop.permute.xlu1 %1163 }
 0x3b0   :  { %v3149_v5 = vpop.permute.xlu0 %1158 }
 0x3b3   :  { %v3155_v43 = vpop.permute.xlu1 %1173 }
 0x3b4   :  { %v3153_v6 = vpop.permute.xlu0 %1168 }
 0x3b7   :  { %v3159_v36 = vpop.permute.xlu1 %1294 }
 0x3b8   :  { %v3157_v49 = vpop.permute.xlu0 %1291  ;;  %vm1323_vm11 = vcmp.eq.s32.totalorder %v3159_v36, 1 }
 0x3b9   :  { %vm1322_vm9 = vcmp.eq.s32.totalorder %v3157_v49, 1 }
 0x3bb   :  { %v3163_v34 = vpop.permute.xlu1 %1300 }
 0x3bc   :  { %v3161_v47 = vpop.permute.xlu0 %1297  ;;  %vm1325_vm10 = vcmp.eq.s32.totalorder %v3163_v34, 1 }
 0x3bd   :  { %vm1324_vm8 = vcmp.eq.s32.totalorder %v3161_v47, 1 }
 0x3bf   :  { %v3199_v60 = vpop.permute.xlu1 %1183 }
 0x3c0   :  { %v3187_v13 = vpop.permute.xlu0 %1178 }
 0x400   :  { %v2444_v50 = vpop.f32.mrb[16].mxu1 }
 0x401   :  { %v1198_v53 = vmul.f32 %v2444_v50, %v1129_v41  ;;  %v1053_v7 = vpop.f32.mrb[17].mxu1 }
 0x402   :  { %v1196_v31 = vmul.f32 %v1119_v25, %v1053_v7  ;;  %v2445_v33 = vpop.f32.mrb[18].mxu1 }
 0x403   :  { %v3166_v51 = vadd.f32 %v2878_v27, %v1198_v53  ;;  %v1199_v9 = vmul.f32 %v2445_v33, %v1134_v0  ;;  %v1056_v10 = vpop.f32.mrb[19].mxu1 }
 0x404   :  { %v3170_v52 = vadd.f32 %v2878_v27, %v1196_v31  ;;  %v1197_v11 = vmul.f32 %v1124_v1, %v1056_v10  ;;  %v1194_v10 = vpop.permute.xlu1 %1193 }
 0x405   :  { %v1332_v12 = vsel %vm1316_vm0, %v3166_v51, 0.0  ;;  %v3177_v54 = vadd.f32 %v2878_v27, %v1199_v9 }
 0x406   :  { %v3181_v37 = vadd.f32 %v2878_v27, %v1197_v11  ;;  %v1330_v55 = vsel %vm1314_vm1, %v3170_v52, 0.0  ;;  %v1357_v56 = vmax.f32 %v1332_v12, 0.0 }
 0x407   :  { %v1333_v14 = vsel %vm1317_vm2, %v3177_v54, 0.0  ;;  %v2191_v59 = vpack.c.bf16 %v3177_v54, %v3166_v51  ;;  %v1355_v62 = vmax.f32 %v1330_v55, 0.0 }
 0x408   :  { %v1358_v15 = vmax.f32 %v1333_v14, 0.0  ;;  %v2188_v57 = vpack.c.bf16 %v3181_v37, %v3170_v52  ;;  %v2448_v35 = vpop.f32.mrb[20].mxu1  ;;  %v1331_v58 = vsel %vm1315_vm3, %v3181_v37, 0.0 }
 0x409   :  { %v1202_v61 = vmul.f32 %v2448_v35, %v1149_v45  ;;  %v1069_v24 = vpop.f32.mrb[21].mxu1  ;;  %v1356_v40 = vmax.f32 %v1331_v58, 0.0  ;;  %v2608_v45 = vld [vmem:[%s3532_s11 + $0x8] sm:$0xff]   ;;  %v2609_v58 = vld [vmem:[%s3532_s11 + $0x10] sm:$0xff]  }
 0x40a   :  { %v1200_v63 = vmul.f32 %v1139_v42, %v1069_v24  ;;  %v2449_v25 = vpop.f32.mrb[22].mxu1  ;;  %v1372_v41 = vpack.c.bf16 %v1358_v15, %v1357_v56  ;;  %v1189_v42 = vpop.permute.xlu0 %1188 }
 0x40b   :  { %v3202_v1 = vadd.f32 %v2878_v27, %v1202_v61  ;;  %v1203_v0 = vmul.f32 %v2449_v25, %v1154_v3  ;;  %v1072_v50 = vpop.f32.mrb[23].mxu1  ;;  %v1371_v53 = vpack.c.bf16 %v1356_v40, %v1355_v62 }
 0x40c   :  { %v3206_v7 = vadd.f32 %v2878_v27, %v1200_v63  ;;  %v1201_v31 = vmul.f32 %v1144_v28, %v1072_v50 }
 0x40d   :  { %v1336_v33 = vsel %vm1320_vm4, %v3202_v1, 0.0  ;;  %v3216_v3 = vadd.f32 %v2878_v27, %v1203_v0  ;;  %2474 = vmatprep.mubr.bf16.mxu0 %v1371_v53 }
 0x40e   :  { %v1334_v28 = vsel %vm1318_vm5, %v3206_v7, 0.0  ;;  %v3223_v9 = vadd.f32 %v2878_v27, %v1201_v31  ;;  %2475 = vmatmul.mubr.bf16.vlgmr.msra.gmra.mrb[32].mxu0 %v1372_v41  ;;  %v1361_v55 = vmax.f32 %v1336_v33, 0.0  ;;  %v3242_v41 = vpop.permute.xlu0 %1303 }
 0x40f   :  { %v1337_v11 = vsel %vm1321_vm6, %v3216_v3, 0.0  ;;  %v2197_v12 = vpack.c.bf16 %v3216_v3, %v3202_v1  ;;  %2491 = vmatpush3.bf16.msra.mxu0 %v3130_v38  ;;  %v1359_v61 = vmax.f32 %v1334_v28, 0.0  ;;  %v3257_v28 = vpop.permute.xlu1 %1306  ;;  %vm1326_vm13 = vcmp.eq.s32.totalorder %v3242_v41, 1 }
 0x410   :  { %v1362_v14 = vmax.f32 %v1337_v11, 0.0  ;;  %v1335_v56 = vsel %vm1319_vm7, %v3223_v9, 0.0  ;;  %v2194_v15 = vpack.c.bf16 %v3223_v9, %v3206_v7  ;;  %v2452_v35 = vpop.f32.mrb[24].mxu1  ;;  %2492 = vmatprep.subr.bf16.mxu0 %v2608_v45  ;;  %vm3540_vm15 = vcmp.eq.s32.totalorder %v3257_v28, 1 }
 0x411   :  { %v1360_v24 = vmax.f32 %v1335_v56, 0.0  ;;  %v1206_v62 = vmul.f32 %v2452_v35, %v3153_v6  ;;  %v1085_v38 = vpop.f32.mrb[25].mxu1 }
 0x412   :  { %v1204_v40 = vmul.f32 %v3149_v5, %v1085_v38  ;;  %v2453_v63 = vpop.f32.mrb[26].mxu1  ;;  %v1374_v25 = vpack.c.bf16 %v1362_v14, %v1361_v55  ;;  %v2610_v5 = vld [vmem:[%s3532_s11 + $0x18] sm:$0xff]   ;;  %v2611_v38 = vld [vmem:[%s3532_s11 + $0x20] sm:$0xff]  }
 0x413   :  { %v3245_v0 = vadd.f32 %v2878_v27, %v1206_v62  ;;  %v1207_v50 = vmul.f32 %v2453_v63, %v3155_v43  ;;  %2493 = vmatpush3.bf16.msra.mxu0 %v2608_v45  ;;  %v1088_v53 = vpop.f32.mrb[27].mxu1  ;;  %v1373_v31 = vpack.c.bf16 %v1360_v24, %v1359_v61 }
 0x414   :  { %v3250_v33 = vadd.f32 %v2878_v27, %v1204_v40  ;;  %v1205_v6 = vmul.f32 %v3151_v30, %v1088_v53  ;;  %2494 = vmatprep.subr.bf16.mxu0 %v2609_v58  ;;  %v3286_v40 = vpop.permute.xlu0 %1309 }
 0x415   :  { %v1340_v43 = vsel %vm1324_vm8, %v3245_v0, 0.0  ;;  %v3263_v45 = vadd.f32 %v2878_v27, %v1207_v50  ;;  %2478 = vmatprep.mubr.bf16.mxu0 %v1373_v31  ;;  %vm3539_vm12 = vcmp.eq.s32.totalorder %v3286_v40, 1 }
 0x416   :  { %v1338_v30 = vsel %vm1322_vm9, %v3250_v33, 0.0  ;;  %v3270_v11 = vadd.f32 %v2878_v27, %v1205_v6  ;;  %2479 = vmatmul.mubr.bf16.gmra.mrb[36].mxu0 %v1374_v25  ;;  %v1365_v56 = vmax.f32 %v1340_v43, 0.0  ;;  %v1313_v43 = vpop.permute.xlu1 %1312 }
 0x417   :  { %v1341_v55 = vsel %vm1325_vm10, %v3263_v45, 0.0  ;;  %2495 = vmatpush3.bf16.msra.mxu0 %v2609_v58  ;;  %v1363_v63 = vmax.f32 %v1338_v30, 0.0  ;;  %vm3538_vm14 = vcmp.eq.s32.totalorder %v1313_v43, 1  ;;  %v3542_v29 = vpack.c.bf16 %v3263_v45, %v3245_v0 }
 0x418   :  { %v1366_v35 = vmax.f32 %v1341_v55, 0.0  ;;  %v1339_v61 = vsel %vm1323_vm11, %v3270_v11, 0.0  ;;  %v2200_v24 = vpack.c.bf16 %v3270_v11, %v3250_v33  ;;  %v2456_v62 = vpop.f32.mrb[28].mxu1  ;;  %2496 = vmatprep.subr.bf16.mxu0 %v2610_v5 }
 0x419   :  { %v1364_v25 = vmax.f32 %v1339_v61, 0.0  ;;  %v1210_v58 = vmul.f32 %v2456_v62, %v1189_v42  ;;  %v1101_v50 = vpop.f32.mrb[29].mxu1 }
 0x41a   :  { %v1208_v53 = vmul.f32 %v3187_v13, %v1101_v50  ;;  %v2457_v31 = vpop.f32.mrb[30].mxu1  ;;  %v1376_v6 = vpack.c.bf16 %v1366_v35, %v1365_v56  ;;  %v2612_v13 = vld [vmem:[%s3532_s11 + $0x28] sm:$0xff]  }
 0x41b   :  { %v1232_v55 = vadd.f32 %v2878_v27, %v1210_v58  ;;  %v1211_v33 = vmul.f32 %v2457_v31, %v1194_v10  ;;  %2497 = vmatpush3.bf16.msra.mxu0 %v2610_v5  ;;  %v1104_v11 = vpop.f32.mrb[31].mxu1  ;;  %v1375_v26 = vpack.c.bf16 %v1364_v25, %v1363_v63 }
 0x41c   :  { %v1230_v14 = vadd.f32 %v2878_v27, %v1208_v53  ;;  %v1209_v30 = vmul.f32 %v3199_v60, %v1104_v11  ;;  %2498 = vmatprep.subr.bf16.mxu0 %v2611_v38 }
 0x41d   :  { %v1344_v42 = vsel %vm3539_vm12, %v1232_v55, 0.0  ;;  %v1233_v10 = vadd.f32 %v2878_v27, %v1211_v33  ;;  %2482 = vmatprep.mubr.bf16.mxu0 %v1375_v26  ;;  %v2613_v26 = vld [vmem:[%s3532_s11 + $0x30] sm:$0xff]   ;;  %vm2190_vm12 = vmpackc.low %vm1317_vm2, %vm1316_vm0 }
 0x41e   :  { %v1342_v5 = vsel %vm1326_vm13, %v1230_v14, 0.0  ;;  %v1231_v56 = vadd.f32 %v2878_v27, %v1209_v30  ;;  %2483 = vmatmul.mubr.bf16.gmra.mrb[40].mxu0 %v1376_v6  ;;  %v1369_v61 = vmax.f32 %v1344_v42, 0.0  ;;  %vm2199_vm0 = vmpackc.low %vm1323_vm11, %vm1322_vm9 }
 0x41f   :  { %v1345_v60 = vsel %vm3538_vm14, %v1233_v10, 0.0  ;;  %v2209_v35 = vpack.c.bf16 %v1233_v10, %v1232_v55  ;;  %2499 = vmatpush3.bf16.msra.mxu0 %v2611_v38  ;;  %v1367_v58 = vmax.f32 %v1342_v5, 0.0  ;;  %v2614_v38 = vld [vmem:[%s3532_s11 + $0x38] sm:$0xff]   ;;  %vm2187_vm14 = vmpackc.low %vm1315_vm3, %vm1314_vm1  ;;  %vm3541_vm3 = vcmp.eq.s32.totalorder %v3257_v28, 1 }
 0x420   :  { %v1370_v62 = vmax.f32 %v1345_v60, 0.0  ;;  %v1343_v63 = vsel %vm3540_vm15, %v1231_v56, 0.0  ;;  %v2206_v25 = vpack.c.bf16 %v1231_v56, %v1230_v14  ;;  %2500 = vmatprep.subr.bf16.mxu0 %v2612_v13  ;;  %vm2193_vm15 = vmpackc.low %vm1319_vm7, %vm1318_vm5  ;;  %vm3543_vm5 = vcmp.eq.s32.totalorder %v3286_v40, 1 }
 0x421   :  { %v1368_v27 = vmax.f32 %v1343_v63, 0.0  ;;  %vm2196_vm1 = vmpackc.low %vm1321_vm6, %vm1320_vm4  ;;  %vm3544_vm6 = vcmp.eq.s32.totalorder %v1313_v43, 1 }
 0x422   :  { %v1378_v50 = vpack.c.bf16 %v1370_v62, %v1369_v61  ;;  %vm2202_vm2 = vmpackc.low %vm1325_vm10, %vm1324_vm8 }
 0x423   :  { %2501 = vmatpush3.bf16.msra.mxu0 %v2612_v13  ;;  %v1377_v53 = vpack.c.bf16 %v1368_v27, %v1367_v58  ;;  %vm2205_vm4 = vmpackc.low %vm3541_vm3, %vm1326_vm13 }
 0x424   :  { %2502 = vmatprep.subr.bf16.mxu0 %v2613_v26  ;;  %vm2208_vm7 = vmpackc.low %vm3544_vm6, %vm3543_vm5 }
 0x425   :  { %2486 = vmatprep.mubr.bf16.mxu0 %v1377_v53 }
 0x426   :  { %2487 = vmatmul.mubr.bf16.gmra.mrb[44].mxu0 %v1378_v50 }
 0x427   :  { %2503 = vmatpush3.bf16.msra.mxu0 %v2613_v26  ;;  %2506 = vmatprep.mubr.msk.bf16.mxu0 %vm2187_vm14, %v2188_v57 }
 0x428   :  { %2504 = vmatprep.subr.bf16.mxu0 %v2614_v38 }
 0x42b   :  { %2505 = vmatpush3.bf16.msra.mxu0 %v2614_v38 }
 0x42e   :  { %2507 = vmatmul.mubr.msk.bf16.vlgmr.msra.gmra.mrb[32].mxu0 %vm2190_vm12, %v2191_v59 }
 0x42f   :  { %2510 = vmatprep.mubr.msk.bf16.mxu0 %vm2193_vm15, %v2194_v15 }
 0x436   :  { %2511 = vmatmul.mubr.msk.bf16.gmra.mrb[36].mxu0 %vm2196_vm1, %v2197_v12 }
 0x437   :  { %2514 = vmatprep.mubr.msk.bf16.mxu0 %vm2199_vm0, %v2200_v24 }
 0x43e   :  { %2515 = vmatmul.mubr.msk.bf16.gmra.mrb[40].mxu0 %vm2202_vm2, %v3542_v29 }
 0x43f   :  { %2518 = vmatprep.mubr.msk.bf16.mxu0 %vm2205_vm4, %v2206_v25 }
 0x446   :  { %2519 = vmatmul.mubr.msk.bf16.gmra.mrb[44].mxu0 %vm2208_vm7, %v2209_v35 }
 0x501   :  { %v2508_v44 = vpop.f32.mrb[32].mxu0 }
 0x502   :  { %v1638_v39 = vpop.f32.mrb[33].mxu0 }
 0x503   :  { %v2509_v2 = vpop.f32.mrb[34].mxu0 }
 0x504   :  { %v1702_v48 = vpack.c.bf16 %v2509_v2, %v2508_v44  ;;  %v1641_v46 = vpop.f32.mrb[35].mxu0 }
 0x505   :  { %v1701_v8 = vpack.c.bf16 %v1641_v46, %v1638_v39 }
 0x507   :  { %2522 = vmatprep.subr.bf16.mxu1 %v1701_v8 }
 0x509   :  { %v2512_v32 = vpop.f32.mrb[36].mxu0 }
 0x50a   :  { %v1654_v49 = vpop.f32.mrb[37].mxu0 }
 0x50b   :  { %v2513_v36 = vpop.f32.mrb[38].mxu0 }
 0x50c   :  { %v1704_v47 = vpack.c.bf16 %v2513_v36, %v2512_v32  ;;  %v1657_v34 = vpop.f32.mrb[39].mxu0 }
 0x50d   :  { %v1703_v51 = vpack.c.bf16 %v1657_v34, %v1654_v49 }
 0x511   :  { %v2516_v52 = vpop.f32.mrb[40].mxu0 }
 0x512   :  { %v1670_v54 = vpop.f32.mrb[41].mxu0 }
 0x513   :  { %v2517_v37 = vpop.f32.mrb[42].mxu0 }
 0x514   :  { %v1706_v59 = vpack.c.bf16 %v2517_v37, %v2516_v52  ;;  %v1673_v57 = vpop.f32.mrb[43].mxu0 }
 0x515   :  { %v1705_v1 = vpack.c.bf16 %v1673_v57, %v1670_v54 }
 0x519   :  { %v2520_v7 = vpop.f32.mrb[44].mxu0 }
 0x51a   :  { %v1686_v3 = vpop.f32.mrb[45].mxu0 }
 0x51b   :  { %v2521_v9 = vpop.f32.mrb[46].mxu0 }
 0x51c   :  { %v1708_v12 = vpack.c.bf16 %v2521_v9, %v2520_v7  ;;  %v1689_v15 = vpop.f32.mrb[47].mxu0 }
 0x51d   :  { %v1707_v41 = vpack.c.bf16 %v1689_v15, %v1686_v3 }
 0x51e   :  { %2621 = dma.done.wait [#allocation7], 1024 }
 0x51f   :  { %2622 = vsyncadd [#allocation7], 4294966272  ;;  %v3545_v0 = vmov 0   ;;  %2523 = vmatpush3.bf16.msra.mxu1 %v1701_v8  ;;  %2538 = vmatprep.mubr.bf16.mxu1 %v2782_v16  ;;  %v1721_v28 = vld [vmem:[%s3531_s10 + $0x10] sm:$0xff]  ;;  %v1719_v45 = vld [vmem:[%s3531_s10] sm:$0xff] }
 0x520   :  { %2616 = vset.pattern.permute.xlu1 %v3545_v0  ;;  %2615 = vset.pattern.permute.xlu0 %v3545_v0  ;;  %v1722_v14 = vld [vmem:[%s3531_s10 + $0x18] sm:$0xff]  ;;  %v1720_v16 = vld [vmem:[%s3531_s10 + $0x8] sm:$0xff]  ;;  %v1723_v40 = vld [vmem:[%s3531_s10 + $0x20] sm:$0xff]  ;;  %vm1950_vm9 = vcmp.gt.f32.partialorder %v1719_v45, 0.0  ;;  %vm1952_vm11 = vcmp.gt.f32.partialorder %v1721_v28, 0.0 }
 0x521   :  { %2524 = vmatprep.subr.bf16.mxu1 %v1702_v48  ;;  %1844 = vperm.xlu1 %2616, %v1721_v28   ;;  %v1724_v24 = vld [vmem:[%s3531_s10 + $0x28] sm:$0xff]  ;;  %v1726_v31 = vld [vmem:[%s3531_s10 + $0x38] sm:$0xff]  ;;  %v1725_v6 = vld [vmem:[%s3531_s10 + $0x30] sm:$0xff]  ;;  %vm1951_vm8 = vcmp.gt.f32.partialorder %v1720_v16, 0.0  ;;  %vm1953_vm10 = vcmp.gt.f32.partialorder %v1722_v14, 0.0  ;;  %v1968_v56 = vsel %vm1952_vm11, 1, %v3545_v0 }
 0x522   :  { %1834 = vperm.xlu0 %2615, %v1719_v45   ;;  %v1728_v43 = vld [vmem:[%s3531_s10 + $0x48] sm:$0xff]  ;;  %v1727_v55 = vld [vmem:[%s3531_s10 + $0x40] sm:$0xff]  ;;  %v1730_v33 = vld [vmem:[%s3531_s10 + $0x58] sm:$0xff]  ;;  %v1967_v5 = vsel %vm1951_vm8, 1, %v3545_v0  ;;  %vm1955_vm12 = vcmp.gt.f32.partialorder %v1724_v24, 0.0  ;;  %vm1954_vm13 = vcmp.gt.f32.partialorder %v1723_v40, 0.0 }
 0x523   :  { %2525 = vmatpush3.bf16.msra.mxu1 %v1702_v48  ;;  %v1729_v11 = vld [vmem:[%s3531_s10 + $0x50] sm:$0xff]  ;;  %v1732_v30 = vld [vmem:[%s3531_s10 + $0x68] sm:$0xff]  ;;  %v1731_v13 = vld [vmem:[%s3531_s10 + $0x60] sm:$0xff]  ;;  %v1971_v60 = vsel %vm1955_vm12, 1, %v3545_v0  ;;  %v1970_v35 = vsel %vm1954_vm13, 1, %v3545_v0  ;;  %vm1957_vm14 = vcmp.gt.f32.partialorder %v1726_v31, 0.0 }
 0x524   :  { %2526 = vmatprep.subr.bf16.mxu1 %v1703_v51  ;;  %v1734_v42 = vld [vmem:[%s3531_s10 + $0x78] sm:$0xff]  ;;  %v1733_v10 = vld [vmem:[%s3531_s10 + $0x70] sm:$0xff]  ;;  %vm1956_vm15 = vcmp.gt.f32.partialorder %v1725_v6, 0.0  ;;  %vm1959_vm1 = vcmp.gt.f32.partialorder %v1728_v43, 0.0  ;;  %vm1958_vm0 = vcmp.gt.f32.partialorder %v1727_v55, 0.0  ;;  %vm1961_vm2 = vcmp.gt.f32.partialorder %v1730_v33, 0.0 }
 0x525   :  { %1849 = vperm.xlu1 %2616, %v1722_v14   ;;  %v1975_v61 = vsel %vm1959_vm1, 1, %v3545_v0  ;;  %v1974_v62 = vsel %vm1958_vm0, 1, %v3545_v0  ;;  %vm1960_vm3 = vcmp.gt.f32.partialorder %v1729_v11, 0.0  ;;  %vm1963_vm4 = vcmp.gt.f32.partialorder %v1732_v30, 0.0 }
 0x526   :  { %1839 = vperm.xlu0 %2615, %v1720_v16   ;;  %vm1962_vm5 = vcmp.gt.f32.partialorder %v1731_v13, 0.0  ;;  %v1979_v63 = vsel %vm1963_vm4, 1, %v3545_v0  ;;  %vm1965_vm6 = vcmp.gt.f32.partialorder %v1734_v42, 0.0  ;;  %vm1964_vm7 = vcmp.gt.f32.partialorder %v1733_v10, 0.0 }
 0x527   :  { %2527 = vmatpush3.bf16.msra.mxu1 %v1703_v51  ;;  %v1978_v25 = vsel %vm1962_vm5, 1, %v3545_v0  ;;  %v1980_v26 = vsel %vm1964_vm7, 1, %v3545_v0 }
 0x528   :  { %2528 = vmatprep.subr.bf16.mxu1 %v1704_v47 }
 0x529   :  { %1859 = vperm.xlu1 %2616, %v1724_v24  }
 0x52a   :  { %1854 = vperm.xlu0 %2615, %v1723_v40  }
 0x52b   :  { %2529 = vmatpush3.bf16.msra.mxu1 %v1704_v47 }
 0x52c   :  { %2530 = vmatprep.subr.bf16.mxu1 %v1705_v1 }
 0x52d   :  { %1869 = vperm.xlu1 %2616, %v1726_v31  }
 0x52e   :  { %1864 = vperm.xlu0 %2615, %v1725_v6  }
 0x52f   :  { %2531 = vmatpush3.bf16.msra.mxu1 %v1705_v1 }
 0x530   :  { %2532 = vmatprep.subr.bf16.mxu1 %v1706_v59 }
 0x531   :  { %1879 = vperm.xlu1 %2616, %v1728_v43  }
 0x532   :  { %1874 = vperm.xlu0 %2615, %v1727_v55  }
 0x533   :  { %2533 = vmatpush3.bf16.msra.mxu1 %v1706_v59 }
 0x534   :  { %2534 = vmatprep.subr.bf16.mxu1 %v1707_v41 }
 0x535   :  { %1889 = vperm.xlu1 %2616, %v1730_v33  }
 0x536   :  { %1884 = vperm.xlu0 %2615, %v1729_v11  }
 0x537   :  { %2535 = vmatpush3.bf16.msra.mxu1 %v1707_v41 }
 0x538   :  { %2536 = vmatprep.subr.bf16.mxu1 %v1708_v12 }
 0x539   :  { %1899 = vperm.xlu1 %2616, %v1732_v30  }
 0x53a   :  { %1894 = vperm.xlu0 %2615, %v1731_v13  }
 0x53b   :  { %2537 = vmatpush3.bf16.msra.mxu1 %v1708_v12 }
 0x53d   :  { %1909 = vperm.xlu1 %2616, %v1734_v42  }
 0x53e   :  { %2539 = vmatmul.mubr.bf16.vlgmr.msra.gmra.mrb[32].mxu1 %v2787_v17  ;;  %1904 = vperm.xlu0 %2615, %v1733_v10   ;;  %v1966_v17 = vsel %vm1950_vm9, 1, %v3545_v0 }
 0x53f   :  { %2542 = vmatprep.mubr.bf16.mxu1 %v2792_v18  ;;  %v1969_v18 = vsel %vm1953_vm10, 1, %v3545_v0 }
 0x541   :  { %1986 = vperm.xlu1 %2616, %v1967_v5  }
 0x542   :  { %1983 = vperm.xlu0 %2615, %v1966_v17  }
 0x545   :  { %1992 = vperm.xlu1 %2616, %v1969_v18  }
 0x546   :  { %2543 = vmatmul.mubr.bf16.gmra.mrb[36].mxu1 %v2797_v19  ;;  %1989 = vperm.xlu0 %2615, %v1968_v56   ;;  %v1973_v19 = vsel %vm1957_vm14, 1, %v3545_v0 }
 0x547   :  { %2546 = vmatprep.mubr.bf16.mxu1 %v2802_v20  ;;  %v1972_v20 = vsel %vm1956_vm15, 1, %v3545_v0 }
 0x549   :  { %1998 = vperm.xlu1 %2616, %v1971_v60  }
 0x54a   :  { %1995 = vperm.xlu0 %2615, %v1970_v35  }
 0x54d   :  { %2004 = vperm.xlu1 %2616, %v1973_v19  }
 0x54e   :  { %2547 = vmatmul.mubr.bf16.gmra.mrb[40].mxu1 %v2807_v21  ;;  %2001 = vperm.xlu0 %2615, %v1972_v20   ;;  %v1977_v21 = vsel %vm1961_vm2, 1, %v3545_v0 }
 0x54f   :  { %2550 = vmatprep.mubr.bf16.mxu1 %v2812_v22  ;;  %v1976_v22 = vsel %vm1960_vm3, 1, %v3545_v0 }
 0x551   :  { %2010 = vperm.xlu1 %2616, %v1975_v61  }
 0x552   :  { %2007 = vperm.xlu0 %2615, %v1974_v62  }
 0x555   :  { %2016 = vperm.xlu1 %2616, %v1977_v21  }
 0x556   :  { %2551 = vmatmul.mubr.bf16.gmra.mrb[44].mxu1 %v2817_v23  ;;  %2013 = vperm.xlu0 %2615, %v1976_v22   ;;  %v1981_v23 = vsel %vm1965_vm6, 1, %v3545_v0 }
 0x559   :  { %2022 = vperm.xlu1 %2616, %v1979_v63  }
 0x55a   :  { %2019 = vperm.xlu0 %2615, %v1978_v25  }
 0x55d   :  { %2028 = vperm.xlu1 %2616, %v1981_v23  }
 0x55e   :  { %2025 = vperm.xlu0 %2615, %v1980_v26  }
 0x5a0   :  { %v1845_v27 = vpop.permute.xlu1 %1844 }
 0x5a1   :  { %v1835_v58 = vpop.permute.xlu0 %1834 }
 0x5a4   :  { %v1850_v53 = vpop.permute.xlu1 %1849 }
 0x5a5   :  { %v1840_v50 = vpop.permute.xlu0 %1839 }
 0x5a8   :  { %v1860_v29 = vpop.permute.xlu1 %1859 }
 0x5a9   :  { %v1855_v38 = vpop.permute.xlu0 %1854 }
 0x5ac   :  { %v1870_v39 = vpop.permute.xlu1 %1869 }
 0x5ad   :  { %v1865_v44 = vpop.permute.xlu0 %1864 }
 0x5b0   :  { %v3435_v48 = vpop.permute.xlu1 %1879 }
 0x5b1   :  { %v3433_v2 = vpop.permute.xlu0 %1874 }
 0x5b4   :  { %v3439_v8 = vpop.permute.xlu1 %1889 }
 0x5b5   :  { %v3437_v46 = vpop.permute.xlu0 %1884 }
 0x5b8   :  { %v3443_v49 = vpop.permute.xlu1 %1899 }
 0x5b9   :  { %v3441_v32 = vpop.permute.xlu0 %1894 }
 0x5bc   :  { %v3447_v47 = vpop.permute.xlu1 %1909 }
 0x5bd   :  { %v3445_v36 = vpop.permute.xlu0 %1904 }
 0x5c0   :  { %v1987_v51 = vpop.permute.xlu1 %1986 }
 0x5c1   :  { %v1984_v34 = vpop.permute.xlu0 %1983  ;;  %vm2031_vm11 = vcmp.eq.s32.totalorder %v1987_v51, 1 }
 0x5c2   :  { %vm2030_vm9 = vcmp.eq.s32.totalorder %v1984_v34, 1 }
 0x5c4   :  { %v1993_v54 = vpop.permute.xlu1 %1992 }
 0x5c5   :  { %v1990_v52 = vpop.permute.xlu0 %1989  ;;  %vm2033_vm10 = vcmp.eq.s32.totalorder %v1993_v54, 1 }
 0x5c6   :  { %vm2032_vm8 = vcmp.eq.s32.totalorder %v1990_v52, 1 }
 0x5c8   :  { %v1999_v59 = vpop.permute.xlu1 %1998 }
 0x5c9   :  { %v1996_v37 = vpop.permute.xlu0 %1995  ;;  %vm2035_vm15 = vcmp.eq.s32.totalorder %v1999_v59, 1 }
 0x5ca   :  { %vm2034_vm13 = vcmp.eq.s32.totalorder %v1996_v37, 1 }
 0x5cc   :  { %v2005_v15 = vpop.permute.xlu1 %2004 }
 0x5cd   :  { %v2002_v1 = vpop.permute.xlu0 %2001  ;;  %vm2037_vm14 = vcmp.eq.s32.totalorder %v2005_v15, 1 }
 0x5ce   :  { %vm2036_vm12 = vcmp.eq.s32.totalorder %v2002_v1, 1 }
 0x5d0   :  { %v2011_v11 = vpop.permute.xlu1 %2010 }
 0x5d1   :  { %v2008_v6 = vpop.permute.xlu0 %2007  ;;  %vm2039_vm3 = vcmp.eq.s32.totalorder %v2011_v11, 1 }
 0x5d2   :  { %vm2038_vm0 = vcmp.eq.s32.totalorder %v2008_v6, 1 }
 0x5d4   :  { %v2017_v21 = vpop.permute.xlu1 %2016 }
 0x5d5   :  { %v2014_v35 = vpop.permute.xlu0 %2013  ;;  %vm2041_vm2 = vcmp.eq.s32.totalorder %v2017_v21, 1 }
 0x5d6   :  { %vm2040_vm1 = vcmp.eq.s32.totalorder %v2014_v35, 1 }
 0x5d8   :  { %v2023_v34 = vpop.permute.xlu1 %2022 }
 0x5d9   :  { %vm2043_vm7 = vcmp.eq.s32.totalorder %v2023_v34, 1 }
 0x611   :  { %v2540_v57 = vpop.f32.mrb[32].mxu1 }
 0x612   :  { %v1914_v7 = vmul.f32 %v2540_v57, %v1845_v27  ;;  %v1769_v3 = vpop.f32.mrb[33].mxu1 }
 0x613   :  { %v1912_v9 = vmul.f32 %v1835_v58, %v1769_v3  ;;  %v2541_v12 = vpop.f32.mrb[34].mxu1  ;;  %v2029_v3 = vpop.permute.xlu1 %2028 }
 0x614   :  { %v1936_v41 = vadd.f32 %v3030_v4, %v1914_v7  ;;  %v1915_v0 = vmul.f32 %v2541_v12, %v1850_v53  ;;  %v1772_v28 = vpop.f32.mrb[35].mxu1  ;;  %vm2045_vm6 = vcmp.eq.s32.totalorder %v2029_v3, 1 }
 0x615   :  { %v1934_v45 = vadd.f32 %v3030_v4, %v1912_v9  ;;  %v1913_v14 = vmul.f32 %v1840_v50, %v1772_v28  ;;  %v2020_v50 = vpop.permute.xlu0 %2019 }
 0x616   :  { %v2048_v16 = vsel %vm2032_vm8, %v1936_v41, 0.0  ;;  %v1937_v24 = vadd.f32 %v3030_v4, %v1915_v0  ;;  %vm2042_vm5 = vcmp.eq.s32.totalorder %v2020_v50, 1 }
 0x617   :  { %2064 = vst [vmem:[%s3535_s14 + $0x10] sm:$0xff] %v2048_v16  ;;  %v2046_v40 = vsel %vm2030_vm9, %v1934_v45, 0.0  ;;  %v1935_v31 = vadd.f32 %v3030_v4, %v1913_v14 }
 0x618   :  { %2062 = vst [vmem:[%s3535_s14] sm:$0xff] %v2046_v40  ;;  %v2049_v43 = vsel %vm2033_vm10, %v1937_v24, 0.0 }
 0x619   :  { %2065 = vst [vmem:[%s3535_s14 + $0x18] sm:$0xff] %v2049_v43  ;;  %v2047_v55 = vsel %vm2031_vm11, %v1935_v31, 0.0  ;;  %v2544_v33 = vpop.f32.mrb[36].mxu1  ;;  %v2026_v37 = vpop.permute.xlu0 %2025 }
 0x61a   :  { %2063 = vst [vmem:[%s3535_s14 + $0x8] sm:$0xff] %v2047_v55  ;;  %v1918_v30 = vmul.f32 %v2544_v33, %v1865_v44  ;;  %v1785_v13 = vpop.f32.mrb[37].mxu1  ;;  %vm2044_vm4 = vcmp.eq.s32.totalorder %v2026_v37, 1 }
 0x61b   :  { %v1916_v42 = vmul.f32 %v1855_v38, %v1785_v13  ;;  %v2545_v10 = vpop.f32.mrb[38].mxu1 }
 0x61c   :  { %v1940_v5 = vadd.f32 %v3030_v4, %v1918_v30  ;;  %v1919_v17 = vmul.f32 %v2545_v10, %v1870_v39  ;;  %v1788_v18 = vpop.f32.mrb[39].mxu1 }
 0x61d   :  { %v1938_v56 = vadd.f32 %v3030_v4, %v1916_v42  ;;  %v1917_v60 = vmul.f32 %v1860_v29, %v1788_v18 }
 0x61e   :  { %v2052_v19 = vsel %vm2036_vm12, %v1940_v5, 0.0  ;;  %v1941_v20 = vadd.f32 %v3030_v4, %v1919_v17 }
 0x61f   :  { %2068 = vst [vmem:[%s3535_s14 + $0x30] sm:$0xff] %v2052_v19  ;;  %v2050_v61 = vsel %vm2034_vm13, %v1938_v56, 0.0  ;;  %v1939_v62 = vadd.f32 %v3030_v4, %v1917_v60 }
 0x620   :  { %2066 = vst [vmem:[%s3535_s14 + $0x20] sm:$0xff] %v2050_v61  ;;  %v2053_v22 = vsel %vm2037_vm14, %v1941_v20, 0.0 }
 0x621   :  { %2069 = vst [vmem:[%s3535_s14 + $0x38] sm:$0xff] %v2053_v22  ;;  %v2051_v63 = vsel %vm2035_vm15, %v1939_v62, 0.0  ;;  %v2548_v25 = vpop.f32.mrb[40].mxu1 }
 0x622   :  { %2067 = vst [vmem:[%s3535_s14 + $0x28] sm:$0xff] %v2051_v63  ;;  %v1922_v23 = vmul.f32 %v2548_v25, %v3437_v46  ;;  %v1801_v26 = vpop.f32.mrb[41].mxu1 }
 0x623   :  { %v1920_v58 = vmul.f32 %v3433_v2, %v1801_v26  ;;  %v2549_v27 = vpop.f32.mrb[42].mxu1 }
 0x624   :  { %v1944_v53 = vadd.f32 %v3030_v4, %v1922_v23  ;;  %v1923_v38 = vmul.f32 %v2549_v27, %v3439_v8  ;;  %v1804_v29 = vpop.f32.mrb[43].mxu1 }
 0x625   :  { %v1942_v44 = vadd.f32 %v3030_v4, %v1920_v58  ;;  %v1921_v39 = vmul.f32 %v3435_v48, %v1804_v29 }
 0x626   :  { %v2056_v51 = vsel %vm2040_vm1, %v1944_v53, 0.0  ;;  %v1945_v46 = vadd.f32 %v3030_v4, %v1923_v38 }
 0x627   :  { %2072 = vst [vmem:[%s3535_s14 + $0x50] sm:$0xff] %v2056_v51  ;;  %v2054_v2 = vsel %vm2038_vm0, %v1942_v44, 0.0  ;;  %v1943_v52 = vadd.f32 %v3030_v4, %v1921_v39 }
 0x628   :  { %2070 = vst [vmem:[%s3535_s14 + $0x40] sm:$0xff] %v2054_v2  ;;  %v2057_v8 = vsel %vm2041_vm2, %v1945_v46, 0.0 }
 0x629   :  { %2073 = vst [vmem:[%s3535_s14 + $0x58] sm:$0xff] %v2057_v8  ;;  %v2055_v48 = vsel %vm2039_vm3, %v1943_v52, 0.0  ;;  %v2552_v54 = vpop.f32.mrb[44].mxu1 }
 0x62a   :  { %2071 = vst [vmem:[%s3535_s14 + $0x48] sm:$0xff] %v2055_v48  ;;  %v1926_v59 = vmul.f32 %v2552_v54, %v3445_v36  ;;  %v1817_v57 = vpop.f32.mrb[45].mxu1 }
 0x62b   :  { %v1924_v1 = vmul.f32 %v3441_v32, %v1817_v57  ;;  %v2553_v7 = vpop.f32.mrb[46].mxu1 }
 0x62c   :  { %v1948_v9 = vadd.f32 %v3030_v4, %v1926_v59  ;;  %v1927_v12 = vmul.f32 %v2553_v7, %v3447_v47  ;;  %v1820_v15 = vpop.f32.mrb[47].mxu1 }
 0x62d   :  { %v1946_v41 = vadd.f32 %v3030_v4, %v1924_v1  ;;  %v1925_v0 = vmul.f32 %v3443_v49, %v1820_v15 }
 0x62e   :  { %v2060_v28 = vsel %vm2044_vm4, %v1948_v9, 0.0  ;;  %v1949_v45 = vadd.f32 %v3030_v4, %v1927_v12 }
 0x62f   :  { %2076 = vst [vmem:[%s3535_s14 + $0x70] sm:$0xff] %v2060_v28  ;;  %v2058_v32 = vsel %vm2042_vm5, %v1946_v41, 0.0  ;;  %v1947_v36 = vadd.f32 %v3030_v4, %v1925_v0 }
 0x630   :  { %2074 = vst [vmem:[%s3535_s14 + $0x60] sm:$0xff] %v2058_v32  ;;  %v2061_v47 = vsel %vm2045_vm6, %v1949_v45, 0.0 }
 0x631   :  { %2077 = vst [vmem:[%s3535_s14 + $0x78] sm:$0xff] %v2061_v47  ;;  %v2059_v49 = vsel %vm2043_vm7, %v1947_v36, 0.0 }
 0x632   :  { %2075 = vst [vmem:[%s3535_s14 + $0x68] sm:$0xff] %v2059_v49 }
 0x633   :  { %2082 = vsyncmov [#allocation3] }
 0x636   :  { %s2083_s15 = vpop.sfrf %2082 }
 0x637   :  { %p2212_p0 = scmp.ne.s32.totalorder %s2083_s15, 0 }
 0x639   :  { %2087 = shalt.err (%p2212_p0)  }
 0x63a   :  { %2089 = vsyncmov [#allocation3 + $0x1] }
 0x63d   :  { %s2090_s16 = vpop.sfrf %2089 }
 0x63e   :  { %p2213_p1 = scmp.ne.s32.totalorder %s2090_s16, 0 }
 0x640   :  { %2094 = shalt.err (%p2213_p1)  }
 0x641   :  { %2095 = vsyncmov [#allocation5] }
 0x644   :  { %s2096_s9 = vpop.sfrf %2095 }
 0x645   :  { %p2214_p2 = scmp.ne.s32.totalorder %s2096_s9, 0 }
 0x647   :  { %2100 = shalt.err (%p2214_p2)  }
 0x648   :  { %2102 = vsyncmov [#allocation5 + $0x1] }
 0x64b   :  { %s2103_s3 = vpop.sfrf %2102 }
 0x64c   :  { %p2215_p3 = scmp.ne.s32.totalorder %s2103_s3, 0 }
 0x64e   :  { %2107 = shalt.err (%p2215_p3)  }
 0x64f   :  { %2108 = vsyncmov [#allocation7] }
 0x652   :  { %s2109_s17 = vpop.sfrf %2108 }
 0x653   :  { %p2216_p4 = scmp.ne.s32.totalorder %s2109_s17, 0 }
 0x655   :  { %2113 = shalt.err (%p2216_p4)  }
 0x656   :  { %2115 = vsyncmov [#allocation7 + $0x1] }
 0x659   :  { %s2116_s14 = vpop.sfrf %2115 }
 0x65a   :  { %p2217_p5 = scmp.ne.s32.totalorder %s2116_s14, 0 }
 0x65c   :  { %2120 = shalt.err (%p2217_p5)  }

</bundles_post_ra>
